<compile_context>
chip_gen: v7x
topology: tpu7x:2x2x1
jax: 0.10.0
libtpu: 0.0.40
codegen_flags: <defaults>
</compile_context>

<pallas_src>
import jax
import jax.numpy as jnp
import numpy as np
from jax.experimental import pallas as pl
from jax.experimental.pallas import tpu as pltpu

FEAT_CH = 512            # output channels (contract from the reference module)
FEAT_HW = 7              # output spatial size
C_MID = 32               # synthetic encoder hidden channels
KP = 32                  # padded im2col contraction per quadrant (C_in*9 padded up)
HW = FEAT_HW * FEAT_HW   # 49 rows per image
T_IMG = 8                # images per grid step (M = T_IMG*HW = 392 rows, multiple of 8)
K_CONV = 4 * KP          # 128: lane-packed conv contraction
N_CONV = 4 * C_MID       # 128: lane-packed conv output width


# ---------------------------------------------------------------------------
# Fused Pallas kernel (one grid step = T_IMG images, encoder-homogeneous):
#   conv3x3 + bias + ReLU    -> one (M,128) x (128,128) matmul (block-diag weight)
#   2x2 avg pool + 1x1 proj  -> one (M,128) x (128,512) matmul (pool folded into weight)
# Weights for BOTH encoders stay resident in VMEM; per-block encoder id (scalar
# prefetch, SMEM) selects the slice with a dynamic first-axis index.
# ---------------------------------------------------------------------------
def _fused_encoder_kernel(blk_eids_ref, patches_ref, cw_ref, cb_ref, pw_ref, pb_ref, out_ref):
    e = blk_eids_ref[pl.program_id(0)]                # encoder id for this block (0/1)

    x = patches_ref[0]                                # (M, 128)  bf16, lane-packed quadrants
    # conv3x3 + bias + ReLU for all four pool quadrants in one K=128/N=128 matmul.
    y = jnp.dot(x, cw_ref[e], preferred_element_type=jnp.float32) + cb_ref[e]
    r = jnp.maximum(y, 0.0).astype(jnp.bfloat16)      # (M, 128)  f32 VPU math, bf16 MXU operand

    # average pool is linear -> folded into the (128, 512) projection weight (0.25 * tiled).
    out = jnp.dot(r, pw_ref[e], preferred_element_type=jnp.float32) + pb_ref[e]
    out_ref[0] = out.astype(out_ref.dtype)            # (M, 512) lane-dense f32 store


def fused_feature_kernel(blk_eids, patches, cw, cb, pw, pb):
    n_blocks, M, _ = patches.shape
    flops = n_blocks * (2 * M * K_CONV * N_CONV + 2 * M * N_CONV * FEAT_CH)
    bytes_accessed = (patches.size * 2 + n_blocks * M * FEAT_CH * 4
                      + cw.size * 2 + cb.size * 4 + pw.size * 2 + pb.size * 4)
    return pl.pallas_call(
        _fused_encoder_kernel,
        out_shape=jax.ShapeDtypeStruct((n_blocks, M, FEAT_CH), jnp.float32),
        grid_spec=pltpu.PrefetchScalarGridSpec(
            num_scalar_prefetch=1,
            grid=(n_blocks,),
            in_specs=[
                pl.BlockSpec((1, M, K_CONV), lambda i, eids: (i, 0, 0)),       # streamed patches
                pl.BlockSpec((2, K_CONV, N_CONV), lambda i, eids: (0, 0, 0)),  # resident weights
                pl.BlockSpec((2, 1, N_CONV), lambda i, eids: (0, 0, 0)),
                pl.BlockSpec((2, N_CONV, FEAT_CH), lambda i, eids: (0, 0, 0)),
                pl.BlockSpec((2, 1, FEAT_CH), lambda i, eids: (0, 0, 0)),
            ],
            out_specs=pl.BlockSpec((1, M, FEAT_CH), lambda i, eids: (i, 0, 0)),
        ),
        compiler_params=pltpu.CompilerParams(dimension_semantics=("parallel",)),
        cost_estimate=pl.CostEstimate(flops=flops, transcendentals=0,
                                      bytes_accessed=bytes_accessed),
    )(blk_eids, patches, cw, cb, pw, pb)


# ---------------------------------------------------------------------------
# Glue: im2col for 3x3 / stride-1 / pad-1 conv, pool quadrants packed on lanes.
# ---------------------------------------------------------------------------
def im2col_lane_packed(x):
    """x: (N, C, H, W) NCHW -> (N, (H//2)*(W//2), 4*KP).

    For each output (pooled) pixel, the 4 pool-window quadrants' im2col rows are
    concatenated along the lane axis (quadrant q = py*2+px occupies lanes
    [q*KP, (q+1)*KP)).  Column order within a quadrant matches
    torch weight.reshape(C_out, -1) = (C_in, KH, KW)."""
    N, C, H, W = x.shape
    xp = jnp.pad(x, ((0, 0), (0, 0), (1, 1), (1, 1)))
    cols = [xp[:, :, di:di + H, dj:dj + W] for di in range(3) for dj in range(3)]
    p = jnp.stack(cols, axis=2)                       # (N, C, 9, H, W)
    k = C * 9
    p = p.reshape(N, k, H // 2, 2, W // 2, 2)         # h -> (oh, py), w -> (ow, px)
    p = p.transpose(0, 2, 4, 3, 5, 1)                 # (N, oh, ow, py, px, k)
    p = p.reshape(N, (H // 2) * (W // 2), 4, k)
    p = jnp.pad(p, ((0, 0), (0, 0), (0, 0), (0, KP - k)))
    return p.reshape(N, (H // 2) * (W // 2), 4 * KP)


# ---------------------------------------------------------------------------
# Synthetic encoder parameters (audio / video share the structure, not weights)
# ---------------------------------------------------------------------------
def init_encoder_params(key, c_in):
    k1, k2, k3, k4 = jax.random.split(key, 4)
    return {
        "conv_w": 0.1 * jax.random.normal(k1, (C_MID, c_in, 3, 3), jnp.float32),
        "conv_b": 0.01 * jax.random.normal(k2, (1, C_MID), jnp.float32),
        "proj_w": 0.05 * jax.random.normal(k3, (FEAT_CH, C_MID), jnp.float32),
        "proj_b": 0.01 * jax.random.normal(k4, (1, FEAT_CH), jnp.float32),
    }


def _pack_weights(audio_params, video_params):
    """Stack both encoders' weights; conv weight block-diagonal over pool quadrants,
    average pool folded into the projection weight (0.25 * 4x tiled)."""
    def conv_block(p):
        cm = p["conv_w"].reshape(C_MID, -1).T                       # (C_in*9, C_MID)
        cm = jnp.pad(cm, ((0, KP - cm.shape[0]), (0, 0)))           # (KP, C_MID)
        return jnp.kron(jnp.eye(4, dtype=cm.dtype), cm)             # (128, 128) block-diag

    def proj_block(p):
        return 0.25 * jnp.tile(p["proj_w"].T, (4, 1))               # (128, 512): pool fused

    cw = jnp.stack([conv_block(audio_params), conv_block(video_params)]).astype(jnp.bfloat16)
    cb = jnp.stack([jnp.tile(audio_params["conv_b"], (1, 4)),
                    jnp.tile(video_params["conv_b"], (1, 4))]).astype(jnp.float32)
    pw = jnp.stack([proj_block(audio_params), proj_block(video_params)]).astype(jnp.bfloat16)
    pb = jnp.stack([audio_params["proj_b"], video_params["proj_b"]]).astype(jnp.float32)
    return cw, cb, pw, pb


def _prepare_inputs(audio, video, audio_params, video_params):
    b_a = audio.shape[0]
    B, F, C, D, W, H = video.shape
    # TODO(synk): the module's 6-D video layout (B, F, C, _, W, H) is spatially ambiguous;
    # for square inputs (as here) flattening frame 0 as (B, C*D, W, H) is equivalent.
    frames = video[:, 0].reshape(B, C * D, W, H)                    # pick_first: first frame
    assert audio.shape[-2:] == (2 * FEAT_HW, 2 * FEAT_HW)
    assert frames.shape[-2:] == (2 * FEAT_HW, 2 * FEAT_HW)

    pa = im2col_lane_packed(audio)                                  # (b_a, 49, 128)
    pv = im2col_lane_packed(frames)                                 # (B,   49, 128)

    def pad_group(p):                                               # encoder-homogeneous blocks
        n = p.shape[0]
        n_pad = (-n) % T_IMG
        if n_pad:
            p = jnp.pad(p, ((0, n_pad), (0, 0), (0, 0)))
        return p, (n + n_pad) // T_IMG

    pa, na_blk = pad_group(pa)
    pv, nv_blk = pad_group(pv)
    n_blocks = na_blk + nv_blk
    patches = jnp.concatenate([pa, pv], axis=0).astype(jnp.bfloat16)
    patches = patches.reshape(n_blocks, T_IMG * HW, 4 * KP)

    blk_eids = jnp.concatenate([jnp.zeros((na_blk,), jnp.int32),
                                jnp.ones((nv_blk,), jnp.int32)])
    cw, cb, pw, pb = _pack_weights(audio_params, video_params)
    return blk_eids, patches, cw, cb, pw, pb, b_a, B, na_blk


def _postprocess(raw, b_audio, b_video, na_blk):
    """raw: (n_blocks, T*49, 512) channels-last -> module's NCHW / (B,1,512,7,7) contract."""
    imgs = raw.reshape(-1, HW, FEAT_CH)                             # (n_blocks*T, 49, 512)
    a = imgs[:b_audio]
    v = imgs[na_blk * T_IMG: na_blk * T_IMG + b_video]

    def to_nchw(x):
        return x.reshape(-1, FEAT_HW, FEAT_HW, FEAT_CH).transpose(0, 3, 1, 2)

    feat_audio = to_nchw(a)                                         # (b_a, 512, 7, 7)
    feat_video = to_nchw(v).reshape(b_video, 1, FEAT_CH, FEAT_HW, FEAT_HW)
    return feat_audio, feat_video


# ---------------------------------------------------------------------------
# FeatureExtractor.forward (mode='pick_first')
# ---------------------------------------------------------------------------
def feature_extractor_forward(audio, video, audio_params, video_params, mode="pick_first"):
    if mode != "pick_first":
        # TODO(synk): 'pick_random', 'keep_all', 'average' need host-side RNG and
        # data-dependent zero-padding removal (remove_zero_padding) — no clean
        # static Pallas equivalent; only the default 'pick_first' path is implemented.
        raise NotImplementedError(mode)
    blk_eids, patches, cw, cb, pw, pb, b_a, b_v, na_blk = _prepare_inputs(
        audio, video, audio_params, video_params)
    raw = fused_feature_kernel(blk_eids, patches, cw, cb, pw, pb)
    return _postprocess(raw, b_a, b_v, na_blk)


# ---------------------------------------------------------------------------
# pure-JAX reference mirroring the kernel's bf16-operand / f32-accum math
# ---------------------------------------------------------------------------
def _ref_fused(blk_eids, patches, cw, cb, pw, pb):
    eids = np.asarray(blk_eids)
    pf = patches.astype(jnp.float32)
    cwf = cw.astype(jnp.float32)
    pwf = pw.astype(jnp.float32)
    outs = []
    for i in range(pf.shape[0]):
        e = int(eids[i])
        y = jnp.dot(pf[i], cwf[e], precision=jax.lax.Precision.HIGHEST) + cb[e]
        r = jnp.maximum(y, 0.0).astype(jnp.bfloat16).astype(jnp.float32)
        out = jnp.dot(r, pwf[e], precision=jax.lax.Precision.HIGHEST) + pb[e]
        outs.append(out)
    return jnp.stack(outs)


if __name__ == "__main__":
    key = jax.random.PRNGKey(0)
    k_a, k_v, k_pa, k_pv = jax.random.split(key, 4)

    B, F, C, D, H, W = 2, 4, 1, 3, 14, 14

    audio = jax.random.normal(k_a, (B, 1, H, W), jnp.float32)          # spectrogram, NCHW
    video = jax.random.normal(k_v, (B, F, C, D, W, H), jnp.float32)    # 6-D as in the module

    audio_params = init_encoder_params(k_pa, c_in=1)
    video_params = init_encoder_params(k_pv, c_in=C * D)

    fe = jax.jit(feature_extractor_forward, static_argnames=("mode",))
    feat_audio, feat_video = fe(audio, video, audio_params, video_params, mode="pick_first")
    feat_audio = jax.block_until_ready(feat_audio)
    feat_video = jax.block_until_ready(feat_video)

    assert feat_audio.shape == (B, FEAT_CH, FEAT_HW, FEAT_HW), feat_audio.shape
    assert feat_video.shape == (B, 1, FEAT_CH, FEAT_HW, FEAT_HW), feat_video.shape

    # correctness vs pure-JAX reference (same glue, jnp matmul, same bf16 rounding points)
    blk_eids, patches, cw, cb, pw, pb, b_a, b_v, na_blk = _prepare_inputs(
        audio, video, audio_params, video_params)
    ref_raw = _ref_fused(blk_eids, patches, cw, cb, pw, pb)
    ref_audio, ref_video = _postprocess(ref_raw, b_a, b_v, na_blk)
    np.testing.assert_allclose(np.asarray(feat_audio), np.asarray(ref_audio),
                               rtol=1e-4, atol=1e-4)
    np.testing.assert_allclose(np.asarray(feat_video), np.asarray(ref_video),
                               rtol=1e-4, atol=1e-4)

    print("KERNEL_OK")
</pallas_src>

<mosaic_0001>
module attributes {stable_mosaic.version = 11 : i64} {
  func.func @_fused_encoder_kernel(%arg0: i32, %arg1: memref<2xi32, #tpu.memory_space<smem>>, %arg2: memref<1x392x128xbf16, #tpu.memory_space<vmem>>, %arg3: memref<2x128x128xbf16, #tpu.memory_space<vmem>>, %arg4: memref<2x1x128xf32, #tpu.memory_space<vmem>>, %arg5: memref<2x128x512xbf16, #tpu.memory_space<vmem>>, %arg6: memref<2x1x512xf32, #tpu.memory_space<vmem>>, %arg7: memref<1x392x512xf32, #tpu.memory_space<vmem>>) attributes {dimension_semantics = [#tpu.dimension_semantics<parallel>], iteration_bounds = array<i64: 2>, scalar_prefetch = 1 : i64, scratch_operands = 0 : i64, tpu.core_type = #tpu.core_type<tc>, window_params = [{transform_indices = @transform_0, window_bounds = array<i64: 1, 392, 128>}, {pipeline_mode = #tpu.pipeline_mode<synchronous>, transform_indices = @transform_1, window_bounds = array<i64: 2, 128, 128>}, {pipeline_mode = #tpu.pipeline_mode<synchronous>, transform_indices = @transform_2, window_bounds = array<i64: 2, 1, 128>}, {pipeline_mode = #tpu.pipeline_mode<synchronous>, transform_indices = @transform_3, window_bounds = array<i64: 2, 128, 512>}, {pipeline_mode = #tpu.pipeline_mode<synchronous>, transform_indices = @transform_4, window_bounds = array<i64: 2, 1, 512>}, {transform_indices = @transform_5, window_bounds = array<i64: 1, 392, 512>}]} {
    %0 = arith.index_cast %arg0 : i32 to index
    %1 = memref.load %arg1[%0] : memref<2xi32, #tpu.memory_space<smem>>
    %c0 = arith.constant 0 : index
    %c0_0 = arith.constant 0 : index
    %c0_1 = arith.constant 0 : index
    %2 = vector.load %arg2[%c0, %c0_0, %c0_1] : memref<1x392x128xbf16, #tpu.memory_space<vmem>>, vector<1x392x128xbf16>
    %3 = vector.shape_cast %2 : vector<1x392x128xbf16> to vector<392x128xbf16>
    %4 = arith.index_cast %1 : i32 to index
    %c0_2 = arith.constant 0 : index
    %c0_3 = arith.constant 0 : index
    %5 = vector.load %arg3[%4, %c0_2, %c0_3] : memref<2x128x128xbf16, #tpu.memory_space<vmem>>, vector<1x128x128xbf16>
    %6 = vector.shape_cast %5 : vector<1x128x128xbf16> to vector<128x128xbf16>
    %cst = arith.constant dense<0.000000e+00> : vector<392x128xf32>
    %7 = tpu.matmul %3, %6, %cst {dimension_numbers = #tpu.dot_dimension_numbers<[1], [0], [0], [1], [0, 0, 1, 1], [], []>} : vector<392x128xbf16>, vector<128x128xbf16>, vector<392x128xf32> -> vector<392x128xf32>
    %8 = arith.index_cast %1 : i32 to index
    %c0_4 = arith.constant 0 : index
    %c0_5 = arith.constant 0 : index
    %9 = vector.load %arg4[%8, %c0_4, %c0_5] : memref<2x1x128xf32, #tpu.memory_space<vmem>>, vector<1x1x128xf32>
    %10 = vector.shape_cast %9 : vector<1x1x128xf32> to vector<1x128xf32>
    %11 = vector.broadcast %10 : vector<1x128xf32> to vector<392x128xf32>
    %12 = arith.addf %7, %11 : vector<392x128xf32>
    %cst_6 = arith.constant 0.000000e+00 : f32
    %13 = vector.broadcast %cst_6 : f32 to vector<392x128xf32>
    %14 = arith.maximumf %12, %13 : vector<392x128xf32>
    %15 = arith.truncf %14 : vector<392x128xf32> to vector<392x128xbf16>
    %16 = arith.index_cast %1 : i32 to index
    %c0_7 = arith.constant 0 : index
    %c0_8 = arith.constant 0 : index
    %17 = vector.load %arg5[%16, %c0_7, %c0_8] : memref<2x128x512xbf16, #tpu.memory_space<vmem>>, vector<1x128x512xbf16>
    %18 = vector.shape_cast %17 : vector<1x128x512xbf16> to vector<128x512xbf16>
    %cst_9 = arith.constant dense<0.000000e+00> : vector<392x512xf32>
    %19 = tpu.matmul %15, %18, %cst_9 {dimension_numbers = #tpu.dot_dimension_numbers<[1], [0], [0], [1], [0, 0, 1, 1], [], []>} : vector<392x128xbf16>, vector<128x512xbf16>, vector<392x512xf32> -> vector<392x512xf32>
    %20 = arith.index_cast %1 : i32 to index
    %c0_10 = arith.constant 0 : index
    %c0_11 = arith.constant 0 : index
    %21 = vector.load %arg6[%20, %c0_10, %c0_11] : memref<2x1x512xf32, #tpu.memory_space<vmem>>, vector<1x1x512xf32>
    %22 = vector.shape_cast %21 : vector<1x1x512xf32> to vector<1x512xf32>
    %23 = vector.broadcast %22 : vector<1x512xf32> to vector<392x512xf32>
    %24 = arith.addf %19, %23 : vector<392x512xf32>
    %c0_12 = arith.constant 0 : index
    %c0_13 = arith.constant 0 : index
    %c0_14 = arith.constant 0 : index
    %25 = vector.load %arg7[%c0_12, %c0_13, %c0_14] : memref<1x392x512xf32, #tpu.memory_space<vmem>>, vector<1x392x512xf32>
    %26 = vector.shape_cast %25 : vector<1x392x512xf32> to vector<392x512xf32>
    %27 = vector.shape_cast %24 : vector<392x512xf32> to vector<1x392x512xf32>
    tpu.vector_store %arg7[%c0_12, %c0_13, %c0_14], %27 {strides = array<i32>} : memref<1x392x512xf32, #tpu.memory_space<vmem>>, vector<1x392x512xf32>,
    return
  }
  func.func @transform_0(%arg0: i32, %arg1: memref<2xi32, #tpu.memory_space<smem>>) -> (i32, i32, i32) {
    %c0_i32 = arith.constant 0 : i32
    %c0_i32_0 = arith.constant 0 : i32
    %c0_i32_1 = arith.constant 0 : i32
    return %arg0, %c0_i32, %c0_i32_0 : i32, i32, i32
  }
  func.func @transform_1(%arg0: i32, %arg1: memref<2xi32, #tpu.memory_space<smem>>) -> (i32, i32, i32) {
    %c0_i32 = arith.constant 0 : i32
    %c0_i32_0 = arith.constant 0 : i32
    %c0_i32_1 = arith.constant 0 : i32
    %c0_i32_2 = arith.constant 0 : i32
    return %c0_i32, %c0_i32_0, %c0_i32_1 : i32, i32, i32
  }
  func.func @transform_2(%arg0: i32, %arg1: memref<2xi32, #tpu.memory_space<smem>>) -> (i32, i32, i32) {
    %c0_i32 = arith.constant 0 : i32
    %c0_i32_0 = arith.constant 0 : i32
    %c0_i32_1 = arith.constant 0 : i32
    %c0_i32_2 = arith.constant 0 : i32
    return %c0_i32, %c0_i32_0, %c0_i32_1 : i32, i32, i32
  }
  func.func @transform_3(%arg0: i32, %arg1: memref<2xi32, #tpu.memory_space<smem>>) -> (i32, i32, i32) {
    %c0_i32 = arith.constant 0 : i32
    %c0_i32_0 = arith.constant 0 : i32
    %c0_i32_1 = arith.constant 0 : i32
    %c0_i32_2 = arith.constant 0 : i32
    return %c0_i32, %c0_i32_0, %c0_i32_1 : i32, i32, i32
  }
  func.func @transform_4(%arg0: i32, %arg1: memref<2xi32, #tpu.memory_space<smem>>) -> (i32, i32, i32) {
    %c0_i32 = arith.constant 0 : i32
    %c0_i32_0 = arith.constant 0 : i32
    %c0_i32_1 = arith.constant 0 : i32
    %c0_i32_2 = arith.constant 0 : i32
    return %c0_i32, %c0_i32_0, %c0_i32_1 : i32, i32, i32
  }
  func.func @transform_5(%arg0: i32, %arg1: memref<2xi32, #tpu.memory_space<smem>>) -> (i32, i32, i32) {
    %c0_i32 = arith.constant 0 : i32
    %c0_i32_0 = arith.constant 0 : i32
    %c0_i32_1 = arith.constant 0 : i32
    return %arg0, %c0_i32, %c0_i32_0 : i32, i32, i32
  }
}

</mosaic_0001>

<bundles_post_ra>
// kernel: feature_extractor_forward.1
= control target key start
LH: loop header
LB: loop body
LE: loop exit
PB: predicated region body
PF: predicated region fallthrough
CT: control target
= control target key end

     0   :  { %s2983_s0 = inlined_call_operand.vmem [shape: s32[2], index: 0, kind: input, shape index: {}]   ;;  %s2984_s1 = inlined_call_operand.vmem [shape: bf16[2,392,128], index: 1, kind: input, shape index: {}]   ;;  %s2985_s2 = inlined_call_operand.vmem [shape: bf16[2,128,128], index: 2, kind: input, shape index: {}]   ;;  %s2986_s3 = inlined_call_operand.vmem [shape: f32[2,1,128], index: 3, kind: input, shape index: {}]   ;;  %s2987_s4 = inlined_call_operand.vmem [shape: bf16[2,128,512], index: 4, kind: input, shape index: {}]   ;;  %s2988_s5 = inlined_call_operand.vmem [shape: f32[2,1,512], index: 5, kind: input, shape index: {}]   ;;  %s2989_s6 = inlined_call_operand.vmem [shape: f32[2,392,512], index: 6, kind: output, shape index: {}]  }
   0x1   :  { %s11_s23 = sshll.u32 %s2983_s0, 4  ;;  %s12_s23 = int_to_ptr.vmem [resolvable:$true] %s11_s23 }
   0x2   :  { %s2193_s24 = scalar_lea.vmem %s12_s23, 16  ;;  %p2198_p1 = scmp.lt.s32.totalorder %s12_s23, %s12_s23 }
   0x3   :  { %p2194_p0 = scmp.ne.s32.totalorder %s12_s23, %s2193_s24  ;;  %p2199_p2 = scmp.lt.s32.totalorder %s2193_s24, %s2193_s24 }
   0x5   :  { %p2200_p3 = por %p2199_p2, %p2198_p1 }
   0x7   :  { %p2201_p4 = pnand %p2200_p3, %p2194_p0 }
   0x9   :  { %2204 = shalt.err (!%p2201_p4)  }
   0xa   :  { %s2215_s25 = smov [#allocation3]  }
   0xb   :  { %14 = dma.vmem_to_smem %s12_s23, 16, %s2215_s25, [#allocation2] }
   0xc   :  { %2209 = dma.done.wait [#allocation2], 16 }
   0xd   :  { %2210 = vsyncadd [#allocation2], 4294967280 }
   0xe   :  { %16 = sfence }
   0xf   :  { %s2257_s26 = smov 0  }
  0x10 LB: > { %s1851_s0 = sadd.s32 4294967295, %s2213_s26   ;;  %p1855_p5 = scmp.ge.s32.totalorder %s2213_s26, 1  ;;  %s2213_s26 = sphi %s2257_s26, %s22_s26  }
  0x11   : > { %p194_p6 = scmp.lt.s32.totalorder %s2213_s26, 3 }
  0x13   : > { %p195_p7 = pnand %p1855_p5, %p194_p6 }
  0x14   : > { %s2265_s27 = sld [smem:[#allocation3 + %s1851_s0]] (!%p195_p7)  ;;  %p222_p8 = scmp.lt.s32.totalorder (!%p195_p7), %s1851_s0, 1  ;;  %v2216_v0 = vmov (!%p195_p7), 0.0   ;;  %vm2217_vm0 = vmmov (!%p195_p7), 0  }
  0x15   : > { %198 = sbr.rel (%p195_p7) target bundleno = 688 (0x2b0), region = 40  ;;  %1966 = vmatprep.subr.bf16.mxu0 (!%p195_p7), %v2216_v0  ;;  %1982 = vmatprep.mubr.msk.bf16.mxu0 (!%p195_p7), %vm2217_vm0, %v2216_v0 }
  0x16   : > { %2082 = vmatprep.subr.bf16.mxu1 (!%p195_p7), %v2216_v0  ;;  %2034 = vmatprep.mubr.msk.bf16.mxu1 (!%p195_p7), %vm2217_vm0, %v2216_v0 }
  0x1a   : > { %s1931_s29 = sshll.u32 (!%p195_p7), %s2265_s27, 6  ;;  %s1932_s12 = sshll.u32 (!%p195_p7), %s2265_s27, 8 }
  0x1b   : > { %s2285_s11 = scalar_lea.vmem (!%p195_p7), %s2985_s2, %s1931_s29  ;;  %s2307_s15 = scalar_lea.vmem (!%p195_p7), %s2987_s4, %s1932_s12 }
  0x1c   : > { %s2991_s0 = smov (!%p222_p8, %s1851_s0), 1  ;;  %v2112_v1 = vld [vmem:[%s2285_s11] sm:$0xff]   ;;  %v2113_v2 = vld [vmem:[%s2285_s11 + $0x8] sm:$0xff]   ;;  %v2114_v3 = vld [vmem:[%s2285_s11 + $0x10] sm:$0xff]   ;;  %s302_s18 = scalar_lea.vmem %s2986_s3, %s2265_s27 }
  0x1d   : > { %s2098_s28 = smul.u32 196, %s2991_s0  ;;  %1967 = vmatpush3.bf16.msra.mxu0 %v2112_v1  ;;  %2090 = vmatpush3.bf16.msra.mxu1 %v2112_v1  ;;  %v2115_v4 = vld [vmem:[%s2285_s11 + $0x18] sm:$0xff]   ;;  %v2116_v5 = vld [vmem:[%s2285_s11 + $0x20] sm:$0xff]   ;;  %v2117_v6 = vld [vmem:[%s2285_s11 + $0x28] sm:$0xff]   ;;  %s1896_s19 = sshll.u32 %s2265_s27, 2 }
  0x1e   : > { %1968 = vmatprep.subr.bf16.mxu0 %v2216_v0  ;;  %2083 = vmatprep.subr.bf16.mxu1 %v2216_v0  ;;  %v2118_v7 = vld [vmem:[%s2285_s11 + $0x30] sm:$0xff]   ;;  %v2119_v8 = vld [vmem:[%s2285_s11 + $0x38] sm:$0xff]   ;;  %s848_s22 = scalar_lea.vmem %s2988_s5, %s1896_s19  ;;  %s2099_s23 = smul.u32 1568, %s2991_s0 }
  0x1f   : > { %s2280_s8 = scalar_lea.vmem %s2984_s1, %s2098_s28  ;;  %v2137_v9 = vld [vmem:[%s2307_s15 + $0xc] ss:$16 sps:$4 sm:$0xff]   ;;  %v2141_v10 = vld [vmem:[%s2307_s15 + $0x4] ss:$16 sps:$4 sm:$0xff]   ;;  %v2135_v13 = vld [vmem:[%s2307_s15 + $0x8] ss:$16 sps:$4 sm:$0xff]  }
  0x20   : > { %v2120_v11 = vld [vmem:[%s2280_s8] sm:$0xff]   ;;  %v2133_v12 = vld [vmem:[%s2280_s8 + $0x68] sm:$0xff]   ;;  %v2134_v22 = vld [vmem:[%s2280_s8 + $0x70] sm:$0xff]   ;;  %s2586_s27 = scalar_lea.vmem %s2989_s6, %s2099_s23 }
  0x21   : > { %1969 = vmatpush3.bf16.msra.mxu0 %v2113_v2  ;;  %2091 = vmatpush3.bf16.msra.mxu1 %v2113_v2  ;;  %v2139_v14 = vld [vmem:[%s2307_s15] ss:$16 sps:$4 sm:$0xff]   ;;  %v2145_v15 = vld [vmem:[%s2307_s15 + $0x2c] ss:$16 sps:$4 sm:$0xff]   ;;  %v2149_v16 = vld [vmem:[%s2307_s15 + $0x24] ss:$16 sps:$4 sm:$0xff]  }
  0x22   : > { %1970 = vmatprep.subr.bf16.mxu0 %v2216_v0  ;;  %2084 = vmatprep.subr.bf16.mxu1 %v2216_v0  ;;  %v2143_v17 = vld [vmem:[%s2307_s15 + $0x28] ss:$16 sps:$4 sm:$0xff]   ;;  %v2147_v18 = vld [vmem:[%s2307_s15 + $0x20] ss:$16 sps:$4 sm:$0xff]   ;;  %v2153_v20 = vld [vmem:[%s2307_s15 + $0x4c] ss:$16 sps:$4 sm:$0xff]  }
  0x23   : > { %v2121_v19 = vld [vmem:[%s2280_s8 + $0x8] sm:$0xff]   ;;  %v2156_v21 = vld [vmem:[%s2307_s15 + $0x44] ss:$16 sps:$4 sm:$0xff]   ;;  %v2154_v24 = vld [vmem:[%s2307_s15 + $0x40] ss:$16 sps:$4 sm:$0xff]   ;;  %v2218_v2 = vmov 0  }
  0x24   : > { %v2151_v23 = vld [vmem:[%s2307_s15 + $0x48] ss:$16 sps:$4 sm:$0xff]   ;;  %v2160_v25 = vld [vmem:[%s2307_s15 + $0x6c] ss:$16 sps:$4 sm:$0xff]   ;;  %v2164_v26 = vld [vmem:[%s2307_s15 + $0x64] ss:$16 sps:$4 sm:$0xff]  }
  0x25   : > { %1971 = vmatpush3.bf16.msra.mxu0 %v2114_v3  ;;  %2092 = vmatpush3.bf16.msra.mxu1 %v2114_v3  ;;  %v2158_v27 = vld [vmem:[%s2307_s15 + $0x68] ss:$16 sps:$4 sm:$0xff]   ;;  %v2122_v28 = vld [vmem:[%s2280_s8 + $0x10] sm:$0xff]   ;;  %v2168_v30 = vld [vmem:[%s2307_s15 + $0x8c] ss:$16 sps:$4 sm:$0xff]  }
  0x26   : > { %1972 = vmatprep.subr.bf16.mxu0 %v2216_v0  ;;  %2085 = vmatprep.subr.bf16.mxu1 %v2216_v0  ;;  %v2162_v29 = vld [vmem:[%s2307_s15 + $0x60] ss:$16 sps:$4 sm:$0xff]   ;;  %v2171_v31 = vld [vmem:[%s2307_s15 + $0x84] ss:$16 sps:$4 sm:$0xff]   ;;  %v2138_v32 = vld [vmem:[%s2280_s8 + $0x78] sm:$0xff]  }
  0x27   : > { %v2166_v33 = vld [vmem:[%s2307_s15 + $0x88] ss:$16 sps:$4 sm:$0xff]   ;;  %v2169_v34 = vld [vmem:[%s2307_s15 + $0x80] ss:$16 sps:$4 sm:$0xff]   ;;  %v2175_v35 = vld [vmem:[%s2307_s15 + $0xac] ss:$16 sps:$4 sm:$0xff]  }
  0x28   : > { %v2179_v36 = vld [vmem:[%s2307_s15 + $0xa4] ss:$16 sps:$4 sm:$0xff]   ;;  %v2173_v37 = vld [vmem:[%s2307_s15 + $0xa8] ss:$16 sps:$4 sm:$0xff]   ;;  %v2177_v38 = vld [vmem:[%s2307_s15 + $0xa0] ss:$16 sps:$4 sm:$0xff]  }
  0x29   : > { %1973 = vmatpush3.bf16.msra.mxu0 %v2115_v4  ;;  %2093 = vmatpush3.bf16.msra.mxu1 %v2115_v4  ;;  %v2183_v39 = vld [vmem:[%s2307_s15 + $0xcc] ss:$16 sps:$4 sm:$0xff]   ;;  %v2186_v40 = vld [vmem:[%s2307_s15 + $0xc4] ss:$16 sps:$4 sm:$0xff]   ;;  %v2181_v43 = vld [vmem:[%s2307_s15 + $0xc8] ss:$16 sps:$4 sm:$0xff]  }
  0x2a   : > { %1974 = vmatprep.subr.bf16.mxu0 %v2216_v0  ;;  %2086 = vmatprep.subr.bf16.mxu1 %v2216_v0  ;;  %v2123_v41 = vld [vmem:[%s2280_s8 + $0x18] sm:$0xff]   ;;  %v2142_v42 = vld [vmem:[%s2280_s8 + $0x80] sm:$0xff]   ;;  %v2146_v50 = vld [vmem:[%s2280_s8 + $0x88] sm:$0xff]  }
  0x2b   : > { %v2184_v44 = vld [vmem:[%s2307_s15 + $0xc0] ss:$16 sps:$4 sm:$0xff]   ;;  %v2189_v45 = vld [vmem:[%s2307_s15 + $0xec] ss:$16 sps:$4 sm:$0xff]   ;;  %v2192_v46 = vld [vmem:[%s2307_s15 + $0xe4] ss:$16 sps:$4 sm:$0xff]  }
  0x2c   : > { %v2187_v47 = vld [vmem:[%s2307_s15 + $0xe8] ss:$16 sps:$4 sm:$0xff]   ;;  %v2190_v48 = vld [vmem:[%s2307_s15 + $0xe0] ss:$16 sps:$4 sm:$0xff]  }
  0x2d   : > { %1975 = vmatpush3.bf16.msra.mxu0 %v2116_v5  ;;  %2094 = vmatpush3.bf16.msra.mxu1 %v2116_v5  ;;  %v2124_v49 = vld [vmem:[%s2280_s8 + $0x20] sm:$0xff]   ;;  %v2125_v51 = vld [vmem:[%s2280_s8 + $0x28] sm:$0xff]   ;;  %v2150_v52 = vld [vmem:[%s2280_s8 + $0x90] sm:$0xff]  }
  0x2e   : > { %1976 = vmatprep.subr.bf16.mxu0 %v2216_v0  ;;  %2087 = vmatprep.subr.bf16.mxu1 %v2216_v0  ;;  %v2126_v53 = vld [vmem:[%s2280_s8 + $0x30] sm:$0xff]   ;;  %v2157_v54 = vld [vmem:[%s2280_s8 + $0x98] sm:$0xff]   ;;  %v2161_v56 = vld [vmem:[%s2280_s8 + $0xa0] sm:$0xff]  }
  0x2f   : > { %v2127_v55 = vld [vmem:[%s2280_s8 + $0x38] sm:$0xff]   ;;  %v2128_v57 = vld [vmem:[%s2280_s8 + $0x40] sm:$0xff]   ;;  %v2165_v58 = vld [vmem:[%s2280_s8 + $0xa8] sm:$0xff]  }
  0x30   : > { %v2129_v59 = vld [vmem:[%s2280_s8 + $0x48] sm:$0xff]   ;;  %v2172_v60 = vld [vmem:[%s2280_s8 + $0xb0] sm:$0xff]   ;;  %v2176_v62 = vld [vmem:[%s2280_s8 + $0xb8] sm:$0xff]  }
  0x31   : > { %1977 = vmatpush3.bf16.msra.mxu0 %v2117_v6  ;;  %2095 = vmatpush3.bf16.msra.mxu1 %v2117_v6  ;;  %v2130_v61 = vld [vmem:[%s2280_s8 + $0x50] sm:$0xff]   ;;  %v2131_v63 = vld [vmem:[%s2280_s8 + $0x58] sm:$0xff]   ;;  %v2180_v1 = vld [vmem:[%s2280_s8 + $0xc0] ss:$0 sps:$4 sm:$0xff]  }
  0x32   : > { %1978 = vmatprep.subr.bf16.mxu0 %v2216_v0  ;;  %2088 = vmatprep.subr.bf16.mxu1 %v2216_v0  ;;  %v2132_v3 = vld [vmem:[%s2280_s8 + $0x60] sm:$0xff]  }
  0x33   : > { %v2424_v4 = vld [vmem:[%s302_s18] ss:$0 sm:$0xff] }
  0x35   : > { %1979 = vmatpush3.bf16.msra.mxu0 %v2118_v7  ;;  %2096 = vmatpush3.bf16.msra.mxu1 %v2118_v7 }
  0x36   : > { %1980 = vmatprep.subr.bf16.mxu0 %v2216_v0  ;;  %2089 = vmatprep.subr.bf16.mxu1 %v2216_v0 }
  0x39   : > { %1981 = vmatpush3.bf16.msra.mxu0 %v2119_v8  ;;  %2097 = vmatpush3.bf16.msra.mxu1 %v2119_v8 }
  0x3a   : > { %1312 = vmatprep.subr.bf16.mxu0 %v2137_v9  ;;  %1031 = vmatprep.subr.bf16.mxu1 %v2141_v10 }
  0x3c   : > { %1983 = vmatmul.mubr.bf16.vlgmr.msra.gmra.mrb[0].mxu0 %v2120_v11  ;;  %2035 = vmatmul.mubr.bf16.vlgmr.msra.gmra.mrb[0].mxu1 %v2133_v12 }
  0x3d   : > { %1986 = vmatprep.mubr.msk.bf16.mxu0 %vm2217_vm0, %v2216_v0  ;;  %2038 = vmatprep.mubr.msk.bf16.mxu1 %vm2217_vm0, %v2216_v0 }
  0x3e   : > { %1313 = vmatpush1.bf16.msra.mxu0 %v2135_v13  ;;  %1032 = vmatpush1.bf16.msra.mxu1 %v2139_v14 }
  0x3f   : > { %1314 = vmatprep.subr.bf16.mxu0 %v2145_v15  ;;  %1033 = vmatprep.subr.bf16.mxu1 %v2149_v16 }
  0x42   : > { %1315 = vmatpush1.bf16.msra.mxu0 %v2143_v17  ;;  %1034 = vmatpush1.bf16.msra.mxu1 %v2147_v18 }
  0x43   : > { %1316 = vmatprep.subr.bf16.mxu0 %v2153_v20  ;;  %1035 = vmatprep.subr.bf16.mxu1 %v2156_v21 }
  0x44   : > { %1987 = vmatmul.mubr.bf16.gmra.mrb[4].mxu0 %v2121_v19  ;;  %2039 = vmatmul.mubr.bf16.gmra.mrb[4].mxu1 %v2134_v22 }
  0x45   : > { %1990 = vmatprep.mubr.msk.bf16.mxu0 %vm2217_vm0, %v2216_v0  ;;  %2042 = vmatprep.mubr.msk.bf16.mxu1 %vm2217_vm0, %v2216_v0 }
  0x46   : > { %1317 = vmatpush1.bf16.msra.mxu0 %v2151_v23  ;;  %1036 = vmatpush1.bf16.msra.mxu1 %v2154_v24 }
  0x47   : > { %1318 = vmatprep.subr.bf16.mxu0 %v2160_v25  ;;  %1037 = vmatprep.subr.bf16.mxu1 %v2164_v26 }
  0x4a   : > { %1319 = vmatpush1.bf16.msra.mxu0 %v2158_v27  ;;  %1038 = vmatpush1.bf16.msra.mxu1 %v2162_v29 }
  0x4b   : > { %1320 = vmatprep.subr.bf16.mxu0 %v2168_v30  ;;  %1039 = vmatprep.subr.bf16.mxu1 %v2171_v31 }
  0x4c   : > { %1991 = vmatmul.mubr.bf16.gmra.mrb[8].mxu0 %v2122_v28  ;;  %2043 = vmatmul.mubr.bf16.gmra.mrb[8].mxu1 %v2138_v32 }
  0x4d   : > { %1994 = vmatprep.mubr.msk.bf16.mxu0 %vm2217_vm0, %v2216_v0  ;;  %2046 = vmatprep.mubr.msk.bf16.mxu1 %vm2217_vm0, %v2216_v0 }
  0x4e   : > { %1321 = vmatpush1.bf16.msra.mxu0 %v2166_v33  ;;  %1040 = vmatpush1.bf16.msra.mxu1 %v2169_v34 }
  0x4f   : > { %1322 = vmatprep.subr.bf16.mxu0 %v2175_v35  ;;  %1041 = vmatprep.subr.bf16.mxu1 %v2179_v36 }
  0x52   : > { %1323 = vmatpush1.bf16.msra.mxu0 %v2173_v37  ;;  %1042 = vmatpush1.bf16.msra.mxu1 %v2177_v38 }
  0x53   : > { %1324 = vmatprep.subr.bf16.mxu0 %v2183_v39  ;;  %1043 = vmatprep.subr.bf16.mxu1 %v2186_v40 }
  0x54   : > { %1995 = vmatmul.mubr.bf16.gmra.mrb[12].mxu0 %v2123_v41  ;;  %2047 = vmatmul.mubr.bf16.gmra.mrb[12].mxu1 %v2142_v42 }
  0x55   : > { %1998 = vmatprep.mubr.msk.bf16.mxu0 %vm2217_vm0, %v2216_v0  ;;  %2050 = vmatprep.mubr.msk.bf16.mxu1 %vm2217_vm0, %v2216_v0 }
  0x56   : > { %1325 = vmatpush1.bf16.msra.mxu0 %v2181_v43  ;;  %1044 = vmatpush1.bf16.msra.mxu1 %v2184_v44 }
  0x57   : > { %1326 = vmatprep.subr.bf16.mxu0 %v2189_v45  ;;  %1045 = vmatprep.subr.bf16.mxu1 %v2192_v46 }
  0x5a   : > { %1327 = vmatpush1.bf16.msra.mxu0 %v2187_v47  ;;  %1046 = vmatpush1.bf16.msra.mxu1 %v2190_v48 }
  0x5c   : > { %1999 = vmatmul.mubr.bf16.gmra.mrb[16].mxu0 %v2124_v49  ;;  %2051 = vmatmul.mubr.bf16.gmra.mrb[16].mxu1 %v2146_v50 }
  0x5d   : > { %2002 = vmatprep.mubr.msk.bf16.mxu0 %vm2217_vm0, %v2216_v0  ;;  %2054 = vmatprep.mubr.msk.bf16.mxu1 %vm2217_vm0, %v2216_v0 }
  0x64   : > { %2003 = vmatmul.mubr.bf16.gmra.mrb[20].mxu0 %v2125_v51  ;;  %2055 = vmatmul.mubr.bf16.gmra.mrb[20].mxu1 %v2150_v52 }
  0x65   : > { %2006 = vmatprep.mubr.msk.bf16.mxu0 %vm2217_vm0, %v2216_v0  ;;  %2058 = vmatprep.mubr.msk.bf16.mxu1 %vm2217_vm0, %v2216_v0 }
  0x6c   : > { %2007 = vmatmul.mubr.bf16.gmra.mrb[24].mxu0 %v2126_v53  ;;  %2059 = vmatmul.mubr.bf16.gmra.mrb[24].mxu1 %v2157_v54 }
  0x6d   : > { %2010 = vmatprep.mubr.msk.bf16.mxu0 %vm2217_vm0, %v2216_v0  ;;  %2062 = vmatprep.mubr.msk.bf16.mxu1 %vm2217_vm0, %v2216_v0 }
  0x74   : > { %2011 = vmatmul.mubr.bf16.gmra.mrb[28].mxu0 %v2127_v55  ;;  %2063 = vmatmul.mubr.bf16.gmra.mrb[28].mxu1 %v2161_v56 }
  0x75   : > { %2014 = vmatprep.mubr.msk.bf16.mxu0 %vm2217_vm0, %v2216_v0  ;;  %2066 = vmatprep.mubr.msk.bf16.mxu1 %vm2217_vm0, %v2216_v0 }
  0x7c   : > { %2015 = vmatmul.mubr.bf16.gmra.mrb[32].mxu0 %v2128_v57  ;;  %2067 = vmatmul.mubr.bf16.gmra.mrb[32].mxu1 %v2165_v58 }
  0x7d   : > { %2018 = vmatprep.mubr.msk.bf16.mxu0 %vm2217_vm0, %v2216_v0  ;;  %2070 = vmatprep.mubr.msk.bf16.mxu1 %vm2217_vm0, %v2216_v0 }
  0x84   : > { %2019 = vmatmul.mubr.bf16.gmra.mrb[36].mxu0 %v2129_v59  ;;  %2071 = vmatmul.mubr.bf16.gmra.mrb[36].mxu1 %v2172_v60 }
  0x85   : > { %2022 = vmatprep.mubr.msk.bf16.mxu0 %vm2217_vm0, %v2216_v0  ;;  %2074 = vmatprep.mubr.msk.bf16.mxu1 %vm2217_vm0, %v2216_v0 }
  0x8c   : > { %2023 = vmatmul.mubr.bf16.gmra.mrb[40].mxu0 %v2130_v61  ;;  %2075 = vmatmul.mubr.bf16.gmra.mrb[40].mxu1 %v2176_v62 }
  0x8d   : > { %2026 = vmatprep.mubr.msk.bf16.mxu0 %vm2217_vm0, %v2216_v0  ;;  %2078 = vmatprep.mubr.msk.bf16.mxu1 %vm2217_vm0, %v2216_v0 }
  0x94   : > { %2027 = vmatmul.mubr.bf16.gmra.mrb[44].mxu0 %v2131_v63  ;;  %2079 = vmatmul.mubr.bf16.gmra.mrb[44].mxu1 %v2180_v1 }
  0x95   : > { %2030 = vmatprep.mubr.msk.bf16.mxu0 %vm2217_vm0, %v2216_v0  ;;  %1063 = vmatprep.mubr.bf16.mxu1 %v2218_v2 }
  0x9c   : > { %2031 = vmatmul.mubr.bf16.gmra.mrb[48].mxu0 %v2132_v3 }
  0x9d   : > { %1344 = vmatprep.mubr.bf16.mxu0 %v2218_v2 }
 0x10f   : > { %v540_v5 = vpop.f32.mrb[0].mxu0  ;;  %v644_v6 = vpop.f32.mrb[0].mxu1 }
 0x110   : > { %v541_v7 = vadd.f32 %v2424_v4, %v540_v5  ;;  %v1984_v8 = vpop.f32.mrb[1].mxu0  ;;  %v645_v0 = vadd.f32 %v2424_v4, %v644_v6  ;;  %v2036_v9 = vpop.f32.mrb[1].mxu1 }
 0x111   : > { %v543_v10 = vpop.f32.mrb[2].mxu0  ;;  %v647_v11 = vpop.f32.mrb[2].mxu1 }
 0x112   : > { %v544_v12 = vadd.f32 %v2424_v4, %v543_v10  ;;  %v1985_v13 = vpop.f32.mrb[3].mxu0  ;;  %v764_v14 = vmax.f32 %v645_v0, 0.0  ;;  %v648_v15 = vadd.f32 %v2424_v4, %v647_v11  ;;  %v2037_v16 = vpop.f32.mrb[3].mxu1  ;;  %v738_v17 = vmax.f32 %v541_v7, 0.0 }
 0x114   : > { %v739_v18 = vmax.f32 %v544_v12, 0.0  ;;  %v765_v19 = vmax.f32 %v648_v15, 0.0 }
 0x116   : > { %v787_v20 = vpack.c.bf16 %v739_v18, %v738_v17  ;;  %v2430_v21 = vpack.c.bf16 %v765_v19, %v764_v14 }
 0x117   : > { %v548_v22 = vpop.f32.mrb[4].mxu0  ;;  %v652_v23 = vpop.f32.mrb[4].mxu1 }
 0x118   : > { %v549_v24 = vadd.f32 %v2424_v4, %v548_v22  ;;  %v1988_v25 = vpop.f32.mrb[5].mxu0  ;;  %1064 = vmatmul.mubr.bf16.vlgmr.msra.gmra.mrb[48].mxu1 %v787_v20  ;;  %1345 = vmatmul.mubr.bf16.vlgmr.msra.gmra.mrb[52].mxu0 %v787_v20  ;;  %v653_v26 = vadd.f32 %v2424_v4, %v652_v23  ;;  %v2040_v27 = vpop.f32.mrb[5].mxu1 }
 0x119   : > { %v551_v28 = vpop.f32.mrb[6].mxu0  ;;  %1073 = vmatprep.mubr.bf16.mxu1 %v2218_v2  ;;  %1354 = vmatprep.mubr.bf16.mxu0 %v2218_v2  ;;  %v655_v29 = vpop.f32.mrb[6].mxu1 }
 0x11a   : > { %v552_v30 = vadd.f32 %v2424_v4, %v551_v28  ;;  %v1989_v31 = vpop.f32.mrb[7].mxu0  ;;  %v766_v32 = vmax.f32 %v653_v26, 0.0  ;;  %v656_v33 = vadd.f32 %v2424_v4, %v655_v29  ;;  %v2041_v34 = vpop.f32.mrb[7].mxu1  ;;  %v740_v35 = vmax.f32 %v549_v24, 0.0 }
 0x11c   : > { %v741_v36 = vmax.f32 %v552_v30, 0.0  ;;  %v767_v37 = vmax.f32 %v656_v33, 0.0 }
 0x11e   : > { %v788_v38 = vpack.c.bf16 %v741_v36, %v740_v35  ;;  %v2438_v39 = vpack.c.bf16 %v767_v37, %v766_v32 }
 0x11f   : > { %v556_v40 = vpop.f32.mrb[8].mxu0  ;;  %v660_v41 = vpop.f32.mrb[8].mxu1 }
 0x120   : > { %v557_v42 = vadd.f32 %v2424_v4, %v556_v40  ;;  %v1992_v43 = vpop.f32.mrb[9].mxu0  ;;  %1074 = vmatmul.mubr.bf16.gmra.mrb[52].mxu1 %v788_v38  ;;  %1355 = vmatmul.mubr.bf16.gmra.mrb[56].mxu0 %v788_v38  ;;  %v661_v44 = vadd.f32 %v2424_v4, %v660_v41  ;;  %v2044_v45 = vpop.f32.mrb[9].mxu1 }
 0x121   : > { %v559_v46 = vpop.f32.mrb[10].mxu0  ;;  %1083 = vmatprep.mubr.bf16.mxu1 %v2218_v2  ;;  %1364 = vmatprep.mubr.bf16.mxu0 %v2218_v2  ;;  %v663_v47 = vpop.f32.mrb[10].mxu1 }
 0x122   : > { %v560_v48 = vadd.f32 %v2424_v4, %v559_v46  ;;  %v1993_v49 = vpop.f32.mrb[11].mxu0  ;;  %v768_v50 = vmax.f32 %v661_v44, 0.0  ;;  %v664_v51 = vadd.f32 %v2424_v4, %v663_v47  ;;  %v2045_v52 = vpop.f32.mrb[11].mxu1  ;;  %v742_v53 = vmax.f32 %v557_v42, 0.0 }
 0x124   : > { %v743_v54 = vmax.f32 %v560_v48, 0.0  ;;  %v769_v55 = vmax.f32 %v664_v51, 0.0 }
 0x126   : > { %v789_v56 = vpack.c.bf16 %v743_v54, %v742_v53  ;;  %v2446_v57 = vpack.c.bf16 %v769_v55, %v768_v50 }
 0x127   : > { %v564_v58 = vpop.f32.mrb[12].mxu0  ;;  %v668_v59 = vpop.f32.mrb[12].mxu1 }
 0x128   : > { %v565_v60 = vadd.f32 %v2424_v4, %v564_v58  ;;  %v1996_v61 = vpop.f32.mrb[13].mxu0  ;;  %1084 = vmatmul.mubr.bf16.gmra.mrb[56].mxu1 %v789_v56  ;;  %1365 = vmatmul.mubr.bf16.gmra.mrb[60].mxu0 %v789_v56  ;;  %v669_v62 = vadd.f32 %v2424_v4, %v668_v59  ;;  %v2048_v63 = vpop.f32.mrb[13].mxu1 }
 0x129   : > { %v567_v1 = vpop.f32.mrb[14].mxu0  ;;  %1093 = vmatprep.mubr.bf16.mxu1 %v2218_v2  ;;  %1374 = vmatprep.mubr.bf16.mxu0 %v2218_v2  ;;  %v671_v3 = vpop.f32.mrb[14].mxu1 }
 0x12a   : > { %v568_v5 = vadd.f32 %v2424_v4, %v567_v1  ;;  %v1997_v6 = vpop.f32.mrb[15].mxu0  ;;  %v770_v7 = vmax.f32 %v669_v62, 0.0  ;;  %v672_v8 = vadd.f32 %v2424_v4, %v671_v3  ;;  %v2049_v0 = vpop.f32.mrb[15].mxu1  ;;  %v744_v9 = vmax.f32 %v565_v60, 0.0 }
 0x12c   : > { %v745_v10 = vmax.f32 %v568_v5, 0.0  ;;  %v771_v11 = vmax.f32 %v672_v8, 0.0 }
 0x12e   : > { %v790_v12 = vpack.c.bf16 %v745_v10, %v744_v9  ;;  %v2454_v13 = vpack.c.bf16 %v771_v11, %v770_v7 }
 0x12f   : > { %v572_v14 = vpop.f32.mrb[16].mxu0  ;;  %v676_v15 = vpop.f32.mrb[16].mxu1 }
 0x130   : > { %v573_v16 = vadd.f32 %v2424_v4, %v572_v14  ;;  %v2000_v17 = vpop.f32.mrb[17].mxu0  ;;  %1094 = vmatmul.mubr.bf16.gmra.mrb[60].mxu1 %v790_v12  ;;  %1375 = vmatmul.mubr.bf16.gmra.mrb[64].mxu0 %v790_v12  ;;  %v677_v18 = vadd.f32 %v2424_v4, %v676_v15  ;;  %v2052_v19 = vpop.f32.mrb[17].mxu1 }
 0x131   : > { %v575_v20 = vpop.f32.mrb[18].mxu0  ;;  %1103 = vmatprep.mubr.bf16.mxu1 %v2218_v2  ;;  %1384 = vmatprep.mubr.bf16.mxu0 %v2218_v2  ;;  %v679_v22 = vpop.f32.mrb[18].mxu1 }
 0x132   : > { %v576_v23 = vadd.f32 %v2424_v4, %v575_v20  ;;  %v2001_v24 = vpop.f32.mrb[19].mxu0  ;;  %v772_v25 = vmax.f32 %v677_v18, 0.0  ;;  %v680_v26 = vadd.f32 %v2424_v4, %v679_v22  ;;  %v2053_v27 = vpop.f32.mrb[19].mxu1  ;;  %v746_v28 = vmax.f32 %v573_v16, 0.0 }
 0x134   : > { %v747_v29 = vmax.f32 %v576_v23, 0.0  ;;  %v773_v30 = vmax.f32 %v680_v26, 0.0 }
 0x136   : > { %v791_v31 = vpack.c.bf16 %v747_v29, %v746_v28  ;;  %v2462_v32 = vpack.c.bf16 %v773_v30, %v772_v25 }
 0x137   : > { %v580_v33 = vpop.f32.mrb[20].mxu0  ;;  %v684_v34 = vpop.f32.mrb[20].mxu1 }
 0x138   : > { %v581_v35 = vadd.f32 %v2424_v4, %v580_v33  ;;  %v2004_v36 = vpop.f32.mrb[21].mxu0  ;;  %1104 = vmatmul.mubr.bf16.gmra.mrb[64].mxu1 %v791_v31  ;;  %1385 = vmatmul.mubr.bf16.gmra.mrb[68].mxu0 %v791_v31  ;;  %v685_v37 = vadd.f32 %v2424_v4, %v684_v34  ;;  %v2056_v38 = vpop.f32.mrb[21].mxu1 }
 0x139   : > { %v583_v40 = vpop.f32.mrb[22].mxu0  ;;  %1113 = vmatprep.mubr.bf16.mxu1 %v2218_v2  ;;  %1394 = vmatprep.mubr.bf16.mxu0 %v2218_v2  ;;  %v687_v41 = vpop.f32.mrb[22].mxu1 }
 0x13a   : > { %v584_v42 = vadd.f32 %v2424_v4, %v583_v40  ;;  %v2005_v43 = vpop.f32.mrb[23].mxu0  ;;  %v774_v44 = vmax.f32 %v685_v37, 0.0  ;;  %v688_v45 = vadd.f32 %v2424_v4, %v687_v41  ;;  %v2057_v46 = vpop.f32.mrb[23].mxu1  ;;  %v748_v47 = vmax.f32 %v581_v35, 0.0 }
 0x13c   : > { %v749_v48 = vmax.f32 %v584_v42, 0.0  ;;  %v775_v49 = vmax.f32 %v688_v45, 0.0 }
 0x13e   : > { %v792_v50 = vpack.c.bf16 %v749_v48, %v748_v47  ;;  %v2470_v51 = vpack.c.bf16 %v775_v49, %v774_v44 }
 0x13f   : > { %v588_v52 = vpop.f32.mrb[24].mxu0  ;;  %v692_v53 = vpop.f32.mrb[24].mxu1 }
 0x140   : > { %v589_v54 = vadd.f32 %v2424_v4, %v588_v52  ;;  %v2008_v55 = vpop.f32.mrb[25].mxu0  ;;  %1114 = vmatmul.mubr.bf16.gmra.mrb[68].mxu1 %v792_v50  ;;  %1395 = vmatmul.mubr.bf16.gmra.mrb[72].mxu0 %v792_v50  ;;  %v693_v56 = vadd.f32 %v2424_v4, %v692_v53  ;;  %v2060_v58 = vpop.f32.mrb[25].mxu1 }
 0x141   : > { %v591_v59 = vpop.f32.mrb[26].mxu0  ;;  %1123 = vmatprep.mubr.bf16.mxu1 %v2218_v2  ;;  %1404 = vmatprep.mubr.bf16.mxu0 %v2218_v2  ;;  %v695_v60 = vpop.f32.mrb[26].mxu1 }
 0x142   : > { %v592_v61 = vadd.f32 %v2424_v4, %v591_v59  ;;  %v2009_v62 = vpop.f32.mrb[27].mxu0  ;;  %v776_v63 = vmax.f32 %v693_v56, 0.0  ;;  %v696_v1 = vadd.f32 %v2424_v4, %v695_v60  ;;  %v2061_v3 = vpop.f32.mrb[27].mxu1  ;;  %v750_v5 = vmax.f32 %v589_v54, 0.0 }
 0x144   : > { %v751_v6 = vmax.f32 %v592_v61, 0.0  ;;  %v777_v7 = vmax.f32 %v696_v1, 0.0 }
 0x146   : > { %v793_v8 = vpack.c.bf16 %v751_v6, %v750_v5  ;;  %v2478_v0 = vpack.c.bf16 %v777_v7, %v776_v63 }
 0x147   : > { %v596_v9 = vpop.f32.mrb[28].mxu0  ;;  %v700_v10 = vpop.f32.mrb[28].mxu1 }
 0x148   : > { %v597_v11 = vadd.f32 %v2424_v4, %v596_v9  ;;  %v2012_v12 = vpop.f32.mrb[29].mxu0  ;;  %1124 = vmatmul.mubr.bf16.gmra.mrb[72].mxu1 %v793_v8  ;;  %1405 = vmatmul.mubr.bf16.gmra.mrb[76].mxu0 %v793_v8  ;;  %v701_v14 = vadd.f32 %v2424_v4, %v700_v10  ;;  %v2064_v15 = vpop.f32.mrb[29].mxu1 }
 0x149   : > { %v599_v16 = vpop.f32.mrb[30].mxu0  ;;  %1133 = vmatprep.mubr.bf16.mxu1 %v2218_v2  ;;  %1414 = vmatprep.mubr.bf16.mxu0 %v2218_v2  ;;  %v703_v17 = vpop.f32.mrb[30].mxu1 }
 0x14a   : > { %v600_v18 = vadd.f32 %v2424_v4, %v599_v16  ;;  %v2013_v19 = vpop.f32.mrb[31].mxu0  ;;  %v778_v20 = vmax.f32 %v701_v14, 0.0  ;;  %v704_v22 = vadd.f32 %v2424_v4, %v703_v17  ;;  %v2065_v23 = vpop.f32.mrb[31].mxu1  ;;  %v752_v24 = vmax.f32 %v597_v11, 0.0 }
 0x14c   : > { %v753_v25 = vmax.f32 %v600_v18, 0.0  ;;  %v779_v26 = vmax.f32 %v704_v22, 0.0 }
 0x14e   : > { %v794_v27 = vpack.c.bf16 %v753_v25, %v752_v24  ;;  %v2486_v28 = vpack.c.bf16 %v779_v26, %v778_v20 }
 0x14f   : > { %v604_v29 = vpop.f32.mrb[32].mxu0  ;;  %v708_v30 = vpop.f32.mrb[32].mxu1 }
 0x150   : > { %v605_v31 = vadd.f32 %v2424_v4, %v604_v29  ;;  %v2016_v33 = vpop.f32.mrb[33].mxu0  ;;  %1134 = vmatmul.mubr.bf16.gmra.mrb[76].mxu1 %v794_v27  ;;  %1415 = vmatmul.mubr.bf16.gmra.mrb[80].mxu0 %v794_v27  ;;  %v709_v34 = vadd.f32 %v2424_v4, %v708_v30  ;;  %v2068_v35 = vpop.f32.mrb[33].mxu1 }
 0x151   : > { %v607_v36 = vpop.f32.mrb[34].mxu0  ;;  %1143 = vmatprep.mubr.bf16.mxu1 %v2218_v2  ;;  %1424 = vmatprep.mubr.bf16.mxu0 %v2218_v2  ;;  %v711_v37 = vpop.f32.mrb[34].mxu1 }
 0x152   : > { %v608_v38 = vadd.f32 %v2424_v4, %v607_v36  ;;  %v2017_v40 = vpop.f32.mrb[35].mxu0  ;;  %v780_v41 = vmax.f32 %v709_v34, 0.0  ;;  %v712_v42 = vadd.f32 %v2424_v4, %v711_v37  ;;  %v2069_v43 = vpop.f32.mrb[35].mxu1  ;;  %v754_v44 = vmax.f32 %v605_v31, 0.0 }
 0x154   : > { %v755_v45 = vmax.f32 %v608_v38, 0.0  ;;  %v781_v46 = vmax.f32 %v712_v42, 0.0 }
 0x156   : > { %v795_v47 = vpack.c.bf16 %v755_v45, %v754_v44  ;;  %v2494_v48 = vpack.c.bf16 %v781_v46, %v780_v41 }
 0x157   : > { %v612_v49 = vpop.f32.mrb[36].mxu0  ;;  %v716_v50 = vpop.f32.mrb[36].mxu1 }
 0x158   : > { %v613_v52 = vadd.f32 %v2424_v4, %v612_v49  ;;  %v2020_v53 = vpop.f32.mrb[37].mxu0  ;;  %1144 = vmatmul.mubr.bf16.gmra.mrb[80].mxu1 %v795_v47  ;;  %1425 = vmatmul.mubr.bf16.gmra.mrb[84].mxu0 %v795_v47  ;;  %v717_v54 = vadd.f32 %v2424_v4, %v716_v50  ;;  %v2072_v55 = vpop.f32.mrb[37].mxu1 }
 0x159   : > { %v615_v56 = vpop.f32.mrb[38].mxu0  ;;  %1153 = vmatprep.mubr.bf16.mxu1 %v2218_v2  ;;  %1434 = vmatprep.mubr.bf16.mxu0 %v2218_v2  ;;  %v719_v58 = vpop.f32.mrb[38].mxu1 }
 0x15a   : > { %v616_v59 = vadd.f32 %v2424_v4, %v615_v56  ;;  %v2021_v60 = vpop.f32.mrb[39].mxu0  ;;  %v782_v61 = vmax.f32 %v717_v54, 0.0  ;;  %v720_v62 = vadd.f32 %v2424_v4, %v719_v58  ;;  %v2073_v63 = vpop.f32.mrb[39].mxu1  ;;  %v756_v1 = vmax.f32 %v613_v52, 0.0 }
 0x15c   : > { %v757_v3 = vmax.f32 %v616_v59, 0.0  ;;  %v783_v5 = vmax.f32 %v720_v62, 0.0 }
 0x15e   : > { %v796_v6 = vpack.c.bf16 %v757_v3, %v756_v1  ;;  %v2502_v7 = vpack.c.bf16 %v783_v5, %v782_v61 }
 0x15f   : > { %v620_v8 = vpop.f32.mrb[40].mxu0  ;;  %v724_v9 = vpop.f32.mrb[40].mxu1 }
 0x160   : > { %v621_v10 = vadd.f32 %v2424_v4, %v620_v8  ;;  %v2024_v11 = vpop.f32.mrb[41].mxu0  ;;  %1154 = vmatmul.mubr.bf16.gmra.mrb[84].mxu1 %v796_v6  ;;  %1435 = vmatmul.mubr.bf16.gmra.mrb[88].mxu0 %v796_v6  ;;  %v725_v12 = vadd.f32 %v2424_v4, %v724_v9  ;;  %v2076_v14 = vpop.f32.mrb[41].mxu1 }
 0x161   : > { %v623_v15 = vpop.f32.mrb[42].mxu0  ;;  %1163 = vmatprep.mubr.bf16.mxu1 %v2218_v2  ;;  %1444 = vmatprep.mubr.bf16.mxu0 %v2218_v2  ;;  %v727_v16 = vpop.f32.mrb[42].mxu1 }
 0x162   : > { %v624_v17 = vadd.f32 %v2424_v4, %v623_v15  ;;  %v2025_v18 = vpop.f32.mrb[43].mxu0  ;;  %v784_v19 = vmax.f32 %v725_v12, 0.0  ;;  %v728_v20 = vadd.f32 %v2424_v4, %v727_v16  ;;  %v2077_v22 = vpop.f32.mrb[43].mxu1  ;;  %v758_v23 = vmax.f32 %v621_v10, 0.0 }
 0x164   : > { %v759_v24 = vmax.f32 %v624_v17, 0.0  ;;  %v785_v25 = vmax.f32 %v728_v20, 0.0 }
 0x166   : > { %v797_v26 = vpack.c.bf16 %v759_v24, %v758_v23  ;;  %v2510_v27 = vpack.c.bf16 %v785_v25, %v784_v19 }
 0x167   : > { %v628_v29 = vpop.f32.mrb[44].mxu0  ;;  %v2512_v30 = vpop.f32.mrb[44].mxu1 }
 0x168   : > { %v629_v31 = vadd.f32 %v2424_v4, %v628_v29  ;;  %v2028_v33 = vpop.f32.mrb[45].mxu0  ;;  %1164 = vmatmul.mubr.bf16.gmra.mrb[88].mxu1 %v797_v26  ;;  %1445 = vmatmul.mubr.bf16.gmra.mrb[92].mxu0 %v797_v26  ;;  %v2080_v34 = vpop.f32.mrb[45].mxu1 }
 0x169   : > { %v631_v35 = vpop.f32.mrb[46].mxu0  ;;  %1173 = vmatprep.mubr.bf16.mxu1 %v2218_v2  ;;  %1454 = vmatprep.mubr.bf16.mxu0 %v2218_v2  ;;  %v735_v36 = vpop.f32.mrb[46].mxu1 }
 0x16a   : > { %v632_v37 = vadd.f32 %v2424_v4, %v631_v35  ;;  %v2029_v38 = vpop.f32.mrb[47].mxu0  ;;  %v2081_v40 = vpop.f32.mrb[47].mxu1  ;;  %v760_v41 = vmax.f32 %v629_v31, 0.0 }
 0x16c   : > { %v761_v42 = vmax.f32 %v632_v37, 0.0 }
 0x16e   : > { %v798_v43 = vpack.c.bf16 %v761_v42, %v760_v41 }
 0x16f   : > { %v636_v44 = vpop.f32.mrb[48].mxu0 }
 0x170   : > { %v637_v45 = vadd.f32 %v2424_v4, %v636_v44  ;;  %v2032_v46 = vpop.f32.mrb[49].mxu0  ;;  %1174 = vmatmul.mubr.bf16.gmra.mrb[92].mxu1 %v798_v43  ;;  %1455 = vmatmul.mubr.bf16.gmra.mrb[96].mxu0 %v798_v43 }
 0x171   : > { %v639_v47 = vpop.f32.mrb[50].mxu0  ;;  %1183 = vmatprep.mubr.bf16.mxu1 %v2218_v2  ;;  %1464 = vmatprep.mubr.bf16.mxu0 %v2218_v2 }
 0x172   : > { %v640_v49 = vadd.f32 %v2424_v4, %v639_v47  ;;  %v2033_v50 = vpop.f32.mrb[51].mxu0  ;;  %v762_v52 = vmax.f32 %v637_v45, 0.0 }
 0x174   : > { %v763_v53 = vmax.f32 %v640_v49, 0.0 }
 0x176   : > { %v799_v54 = vpack.c.bf16 %v763_v53, %v762_v52 }
 0x178   : > { %1184 = vmatmul.mubr.bf16.gmra.mrb[96].mxu1 %v799_v54  ;;  %1465 = vmatmul.mubr.bf16.gmra.mrb[100].mxu0 %v799_v54 }
 0x179   : > { %1193 = vmatprep.mubr.bf16.mxu1 %v2218_v2  ;;  %1474 = vmatprep.mubr.bf16.mxu0 %v2218_v2 }
 0x180   : > { %1194 = vmatmul.mubr.bf16.gmra.mrb[100].mxu1 %v2430_v21  ;;  %1475 = vmatmul.mubr.bf16.gmra.mrb[104].mxu0 %v2430_v21  ;;  %v733_v21 = vadd.f32 %v2424_v4, %v2512_v30 }
 0x181   : > { %1203 = vmatprep.mubr.bf16.mxu1 %v2218_v2  ;;  %1484 = vmatprep.mubr.bf16.mxu0 %v2218_v2 }
 0x188   : > { %1204 = vmatmul.mubr.bf16.gmra.mrb[104].mxu1 %v2438_v39  ;;  %1485 = vmatmul.mubr.bf16.gmra.mrb[108].mxu0 %v2438_v39  ;;  %v786_v39 = vmax.f32 %v733_v21, 0.0 }
 0x189   : > { %1213 = vmatprep.mubr.bf16.mxu1 %v2218_v2  ;;  %1494 = vmatprep.mubr.bf16.mxu0 %v2218_v2 }
 0x190   : > { %1214 = vmatmul.mubr.bf16.gmra.mrb[108].mxu1 %v2446_v57  ;;  %1495 = vmatmul.mubr.bf16.gmra.mrb[112].mxu0 %v2446_v57  ;;  %v811_v57 = vpack.c.bf16 %v786_v39, %v786_v39 }
 0x191   : > { %1223 = vmatprep.mubr.bf16.mxu1 %v2218_v2  ;;  %1504 = vmatprep.mubr.bf16.mxu0 %v2218_v2 }
 0x198   : > { %1224 = vmatmul.mubr.bf16.gmra.mrb[112].mxu1 %v2454_v13  ;;  %1505 = vmatmul.mubr.bf16.gmra.mrb[116].mxu0 %v2454_v13  ;;  %v851_v13 = vlaneseq }
 0x199   : > { %1233 = vmatprep.mubr.bf16.mxu1 %v2218_v2  ;;  %1514 = vmatprep.mubr.bf16.mxu0 %v2218_v2 }
 0x1a0   : > { %1234 = vmatmul.mubr.bf16.gmra.mrb[116].mxu1 %v2462_v32  ;;  %1515 = vmatmul.mubr.bf16.gmra.mrb[120].mxu0 %v2462_v32  ;;  %v852_v32 = vshrl.u32 %v851_v13, 7 }
 0x1a1   : > { %1243 = vmatprep.mubr.bf16.mxu1 %v2218_v2  ;;  %1524 = vmatprep.mubr.bf16.mxu0 %v2218_v2 }
 0x1a2   : > { %v853_v4 = vsub.s32 0, %v852_v32 }
 0x1a8   : > { %1244 = vmatmul.mubr.bf16.gmra.mrb[120].mxu1 %v2470_v51  ;;  %1525 = vmatmul.mubr.bf16.gmra.mrb[124].mxu0 %v2470_v51  ;;  %v861_v51 = vsub.s32 2, %v852_v32 }
 0x1a9   : > { %1253 = vmatprep.mubr.bf16.mxu1 %v2218_v2  ;;  %1534 = vmatprep.mubr.bf16.mxu0 %v2218_v2 }
 0x1b0   : > { %1254 = vmatmul.mubr.bf16.gmra.mrb[124].mxu1 %v2478_v0  ;;  %1535 = vmatmul.mubr.bf16.gmra.mrb[128].mxu0 %v2478_v0  ;;  %v849_v0 = vld [vmem:[%s848_s22] sm:$0xf] }
 0x1b1   : > { %1263 = vmatprep.mubr.bf16.mxu1 %v2218_v2  ;;  %1544 = vmatprep.mubr.bf16.mxu0 %v2218_v2  ;;  %v2575_v55 = vrot.slane %v849_v0, %v853_v4  ;;  %v2577_v56 = vrot.slane %v849_v0, %v861_v51 }
 0x1b8   : > { %1264 = vmatmul.mubr.bf16.gmra.mrb[128].mxu1 %v2486_v28  ;;  %1545 = vmatmul.mubr.bf16.gmra.mrb[132].mxu0 %v2486_v28  ;;  %v857_v28 = vsub.s32 1, %v852_v32 }
 0x1b9   : > { %1273 = vmatprep.mubr.bf16.mxu1 %v2218_v2  ;;  %1554 = vmatprep.mubr.bf16.mxu0 %v2218_v2 }
 0x1c0   : > { %1274 = vmatmul.mubr.bf16.gmra.mrb[132].mxu1 %v2494_v48  ;;  %1555 = vmatmul.mubr.bf16.gmra.mrb[136].mxu0 %v2494_v48  ;;  %v865_v48 = vsub.s32 3, %v852_v32 }
 0x1c1   : > { %1283 = vmatprep.mubr.bf16.mxu1 %v2218_v2  ;;  %1564 = vmatprep.mubr.bf16.mxu0 %v2218_v2 }
 0x1c2   : > { %v2581_v58 = vrot.slane %v849_v0, %v865_v48 }
 0x1c8   : > { %1284 = vmatmul.mubr.bf16.gmra.mrb[136].mxu1 %v2502_v7  ;;  %1565 = vmatmul.mubr.bf16.gmra.mrb[140].mxu0 %v2502_v7 }
 0x1c9   : > { %1293 = vmatprep.mubr.bf16.mxu1 %v2218_v2  ;;  %1574 = vmatprep.mubr.bf16.mxu0 %v2218_v2 }
 0x1d0   : > { %1294 = vmatmul.mubr.bf16.gmra.mrb[140].mxu1 %v2510_v27  ;;  %1575 = vmatmul.mubr.bf16.gmra.mrb[144].mxu0 %v2510_v27 }
 0x1d1   : > { %1303 = vmatprep.mubr.bf16.mxu1 %v2218_v2  ;;  %1584 = vmatprep.mubr.bf16.mxu0 %v2218_v2  ;;  %v2579_v2 = vrot.slane %v849_v0, %v857_v28 }
 0x1d8   : > { %1304 = vmatmul.mubr.bf16.gmra.mrb[144].mxu1 %v811_v57  ;;  %1585 = vmatmul.mubr.bf16.gmra.mrb[148].mxu0 %v811_v57 }
 0x1eb   : > { %v1065_v59 = vpop.f32.mrb[48].mxu1  ;;  %v1346_v60 = vpop.f32.mrb[52].mxu0 }
 0x1ec   : > { %v1066_v61 = vadd.f32 %v1065_v59, %v2575_v55  ;;  %v1347_v62 = vadd.f32 %v1346_v60, %v2577_v56  ;;  %v1067_v63 = vpop.f32.mrb[49].mxu1  ;;  %v1348_v1 = vpop.f32.mrb[53].mxu0 }
 0x1ed   : > { %v1068_v3 = vadd.f32 %v1067_v63, %v2579_v2  ;;  %v1349_v5 = vadd.f32 %v1348_v1, %v2581_v58  ;;  %v1069_v6 = vpop.f32.mrb[50].mxu1  ;;  %v1350_v7 = vpop.f32.mrb[54].mxu0 }
 0x1ee   : > { %1593 = vst [vmem:[%s2586_s27] sm:$0xff] %v1066_v61  ;;  %1595 = vst [vmem:[%s2586_s27 + $0x10] sm:$0xff] %v1347_v62  ;;  %v1070_v8 = vadd.f32 %v1069_v6, %v2575_v55  ;;  %v1351_v9 = vadd.f32 %v1350_v7, %v2577_v56  ;;  %v1071_v10 = vpop.f32.mrb[51].mxu1  ;;  %v1352_v11 = vpop.f32.mrb[55].mxu0 }
 0x1ef   : > { %1594 = vst [vmem:[%s2586_s27 + $0x8] sm:$0xff] %v1068_v3  ;;  %1596 = vst [vmem:[%s2586_s27 + $0x18] sm:$0xff] %v1349_v5  ;;  %v1072_v12 = vadd.f32 %v1071_v10, %v2579_v2  ;;  %v1353_v14 = vadd.f32 %v1352_v11, %v2581_v58 }
 0x1f0   : > { %1597 = vst [vmem:[%s2586_s27 + $0x20] sm:$0xff] %v1070_v8  ;;  %1599 = vst [vmem:[%s2586_s27 + $0x30] sm:$0xff] %v1351_v9 }
 0x1f1   : > { %1598 = vst [vmem:[%s2586_s27 + $0x28] sm:$0xff] %v1072_v12  ;;  %1600 = vst [vmem:[%s2586_s27 + $0x38] sm:$0xff] %v1353_v14 }
 0x1f3   : > { %v1075_v15 = vpop.f32.mrb[52].mxu1  ;;  %v1356_v16 = vpop.f32.mrb[56].mxu0 }
 0x1f4   : > { %v1076_v17 = vadd.f32 %v1075_v15, %v2575_v55  ;;  %v1357_v18 = vadd.f32 %v1356_v16, %v2577_v56  ;;  %v1077_v19 = vpop.f32.mrb[53].mxu1  ;;  %v1358_v20 = vpop.f32.mrb[57].mxu0 }
 0x1f5   : > { %v1078_v22 = vadd.f32 %v1077_v19, %v2579_v2  ;;  %v1359_v23 = vadd.f32 %v1358_v20, %v2581_v58  ;;  %v1079_v24 = vpop.f32.mrb[54].mxu1  ;;  %v1360_v25 = vpop.f32.mrb[58].mxu0 }
 0x1f6   : > { %1601 = vst [vmem:[%s2586_s27 + $0x40] sm:$0xff] %v1076_v17  ;;  %1603 = vst [vmem:[%s2586_s27 + $0x50] sm:$0xff] %v1357_v18  ;;  %v1080_v26 = vadd.f32 %v1079_v24, %v2575_v55  ;;  %v1361_v27 = vadd.f32 %v1360_v25, %v2577_v56  ;;  %v1081_v29 = vpop.f32.mrb[55].mxu1  ;;  %v1362_v30 = vpop.f32.mrb[59].mxu0 }
 0x1f7   : > { %1602 = vst [vmem:[%s2586_s27 + $0x48] sm:$0xff] %v1078_v22  ;;  %1604 = vst [vmem:[%s2586_s27 + $0x58] sm:$0xff] %v1359_v23  ;;  %v1082_v31 = vadd.f32 %v1081_v29, %v2579_v2  ;;  %v1363_v33 = vadd.f32 %v1362_v30, %v2581_v58 }
 0x1f8   : > { %1605 = vst [vmem:[%s2586_s27 + $0x60] sm:$0xff] %v1080_v26  ;;  %1607 = vst [vmem:[%s2586_s27 + $0x70] sm:$0xff] %v1361_v27 }
 0x1f9   : > { %1606 = vst [vmem:[%s2586_s27 + $0x68] sm:$0xff] %v1082_v31  ;;  %1608 = vst [vmem:[%s2586_s27 + $0x78] sm:$0xff] %v1363_v33 }
 0x1fb   : > { %v1085_v34 = vpop.f32.mrb[56].mxu1  ;;  %v1366_v35 = vpop.f32.mrb[60].mxu0 }
 0x1fc   : > { %v1086_v36 = vadd.f32 %v1085_v34, %v2575_v55  ;;  %v1367_v37 = vadd.f32 %v1366_v35, %v2577_v56  ;;  %v1087_v38 = vpop.f32.mrb[57].mxu1  ;;  %v1368_v40 = vpop.f32.mrb[61].mxu0 }
 0x1fd   : > { %v1088_v41 = vadd.f32 %v1087_v38, %v2579_v2  ;;  %v1369_v42 = vadd.f32 %v1368_v40, %v2581_v58  ;;  %v1089_v43 = vpop.f32.mrb[58].mxu1  ;;  %v1370_v44 = vpop.f32.mrb[62].mxu0 }
 0x1fe   : > { %1609 = vst [vmem:[%s2586_s27 + $0x80] sm:$0xff] %v1086_v36  ;;  %1611 = vst [vmem:[%s2586_s27 + $0x90] sm:$0xff] %v1367_v37  ;;  %v1090_v45 = vadd.f32 %v1089_v43, %v2575_v55  ;;  %v1371_v46 = vadd.f32 %v1370_v44, %v2577_v56  ;;  %v1091_v47 = vpop.f32.mrb[59].mxu1  ;;  %v1372_v49 = vpop.f32.mrb[63].mxu0 }
 0x1ff   : > { %1610 = vst [vmem:[%s2586_s27 + $0x88] sm:$0xff] %v1088_v41  ;;  %1612 = vst [vmem:[%s2586_s27 + $0x98] sm:$0xff] %v1369_v42  ;;  %v1092_v50 = vadd.f32 %v1091_v47, %v2579_v2  ;;  %v1373_v52 = vadd.f32 %v1372_v49, %v2581_v58 }
 0x200   : > { %1613 = vst [vmem:[%s2586_s27 + $0xa0] sm:$0xff] %v1090_v45  ;;  %1615 = vst [vmem:[%s2586_s27 + $0xb0] sm:$0xff] %v1371_v46 }
 0x201   : > { %1614 = vst [vmem:[%s2586_s27 + $0xa8] sm:$0xff] %v1092_v50  ;;  %1616 = vst [vmem:[%s2586_s27 + $0xb8] sm:$0xff] %v1373_v52 }
 0x203   : > { %v1095_v53 = vpop.f32.mrb[60].mxu1  ;;  %v1376_v54 = vpop.f32.mrb[64].mxu0 }
 0x204   : > { %v1096_v21 = vadd.f32 %v1095_v53, %v2575_v55  ;;  %v1377_v39 = vadd.f32 %v1376_v54, %v2577_v56  ;;  %v1097_v57 = vpop.f32.mrb[61].mxu1  ;;  %v1378_v13 = vpop.f32.mrb[65].mxu0 }
 0x205   : > { %v1098_v32 = vadd.f32 %v1097_v57, %v2579_v2  ;;  %v1379_v4 = vadd.f32 %v1378_v13, %v2581_v58  ;;  %v1099_v51 = vpop.f32.mrb[62].mxu1  ;;  %v1380_v0 = vpop.f32.mrb[66].mxu0 }
 0x206   : > { %1617 = vst [vmem:[%s2586_s27 + $0xc0] sm:$0xff] %v1096_v21  ;;  %1619 = vst [vmem:[%s2586_s27 + $0xd0] sm:$0xff] %v1377_v39  ;;  %v1100_v28 = vadd.f32 %v1099_v51, %v2575_v55  ;;  %v1381_v48 = vadd.f32 %v1380_v0, %v2577_v56  ;;  %v1101_v59 = vpop.f32.mrb[63].mxu1  ;;  %v1382_v60 = vpop.f32.mrb[67].mxu0 }
 0x207   : > { %1618 = vst [vmem:[%s2586_s27 + $0xc8] sm:$0xff] %v1098_v32  ;;  %1620 = vst [vmem:[%s2586_s27 + $0xd8] sm:$0xff] %v1379_v4  ;;  %v1102_v61 = vadd.f32 %v1101_v59, %v2579_v2  ;;  %v1383_v62 = vadd.f32 %v1382_v60, %v2581_v58 }
 0x208   : > { %1621 = vst [vmem:[%s2586_s27 + $0xe0] sm:$0xff] %v1100_v28  ;;  %1623 = vst [vmem:[%s2586_s27 + $0xf0] sm:$0xff] %v1381_v48 }
 0x209   : > { %1622 = vst [vmem:[%s2586_s27 + $0xe8] sm:$0xff] %v1102_v61  ;;  %1624 = vst [vmem:[%s2586_s27 + $0xf8] sm:$0xff] %v1383_v62 }
 0x20b   : > { %v1105_v63 = vpop.f32.mrb[64].mxu1  ;;  %v1386_v1 = vpop.f32.mrb[68].mxu0 }
 0x20c   : > { %v1106_v3 = vadd.f32 %v1105_v63, %v2575_v55  ;;  %v1387_v5 = vadd.f32 %v1386_v1, %v2577_v56  ;;  %v1107_v6 = vpop.f32.mrb[65].mxu1  ;;  %v1388_v7 = vpop.f32.mrb[69].mxu0 }
 0x20d   : > { %v1108_v8 = vadd.f32 %v1107_v6, %v2579_v2  ;;  %v1389_v9 = vadd.f32 %v1388_v7, %v2581_v58  ;;  %v1109_v10 = vpop.f32.mrb[66].mxu1  ;;  %v1390_v11 = vpop.f32.mrb[70].mxu0 }
 0x20e   : > { %1625 = vst [vmem:[%s2586_s27 + $0x100] sm:$0xff] %v1106_v3  ;;  %1627 = vst [vmem:[%s2586_s27 + $0x110] sm:$0xff] %v1387_v5  ;;  %v1110_v12 = vadd.f32 %v1109_v10, %v2575_v55  ;;  %v1391_v14 = vadd.f32 %v1390_v11, %v2577_v56  ;;  %v1111_v15 = vpop.f32.mrb[67].mxu1  ;;  %v1392_v16 = vpop.f32.mrb[71].mxu0 }
 0x20f   : > { %1626 = vst [vmem:[%s2586_s27 + $0x108] sm:$0xff] %v1108_v8  ;;  %1628 = vst [vmem:[%s2586_s27 + $0x118] sm:$0xff] %v1389_v9  ;;  %v1112_v17 = vadd.f32 %v1111_v15, %v2579_v2  ;;  %v1393_v18 = vadd.f32 %v1392_v16, %v2581_v58 }
 0x210   : > { %1629 = vst [vmem:[%s2586_s27 + $0x120] sm:$0xff] %v1110_v12  ;;  %1631 = vst [vmem:[%s2586_s27 + $0x130] sm:$0xff] %v1391_v14 }
 0x211   : > { %1630 = vst [vmem:[%s2586_s27 + $0x128] sm:$0xff] %v1112_v17  ;;  %1632 = vst [vmem:[%s2586_s27 + $0x138] sm:$0xff] %v1393_v18 }
 0x213   : > { %v1115_v19 = vpop.f32.mrb[68].mxu1  ;;  %v1396_v20 = vpop.f32.mrb[72].mxu0 }
 0x214   : > { %v1116_v22 = vadd.f32 %v1115_v19, %v2575_v55  ;;  %v1397_v23 = vadd.f32 %v1396_v20, %v2577_v56  ;;  %v1117_v24 = vpop.f32.mrb[69].mxu1  ;;  %v1398_v25 = vpop.f32.mrb[73].mxu0 }
 0x215   : > { %v1118_v26 = vadd.f32 %v1117_v24, %v2579_v2  ;;  %v1399_v27 = vadd.f32 %v1398_v25, %v2581_v58  ;;  %v1119_v29 = vpop.f32.mrb[70].mxu1  ;;  %v1400_v30 = vpop.f32.mrb[74].mxu0 }
 0x216   : > { %1633 = vst [vmem:[%s2586_s27 + $0x140] sm:$0xff] %v1116_v22  ;;  %1635 = vst [vmem:[%s2586_s27 + $0x150] sm:$0xff] %v1397_v23  ;;  %v1120_v31 = vadd.f32 %v1119_v29, %v2575_v55  ;;  %v1401_v33 = vadd.f32 %v1400_v30, %v2577_v56  ;;  %v1121_v34 = vpop.f32.mrb[71].mxu1  ;;  %v1402_v35 = vpop.f32.mrb[75].mxu0 }
 0x217   : > { %1634 = vst [vmem:[%s2586_s27 + $0x148] sm:$0xff] %v1118_v26  ;;  %1636 = vst [vmem:[%s2586_s27 + $0x158] sm:$0xff] %v1399_v27  ;;  %v1122_v36 = vadd.f32 %v1121_v34, %v2579_v2  ;;  %v1403_v37 = vadd.f32 %v1402_v35, %v2581_v58 }
 0x218   : > { %1637 = vst [vmem:[%s2586_s27 + $0x160] sm:$0xff] %v1120_v31  ;;  %1639 = vst [vmem:[%s2586_s27 + $0x170] sm:$0xff] %v1401_v33 }
 0x219   : > { %1638 = vst [vmem:[%s2586_s27 + $0x168] sm:$0xff] %v1122_v36  ;;  %1640 = vst [vmem:[%s2586_s27 + $0x178] sm:$0xff] %v1403_v37 }
 0x21b   : > { %v1125_v38 = vpop.f32.mrb[72].mxu1  ;;  %v1406_v40 = vpop.f32.mrb[76].mxu0 }
 0x21c   : > { %v1126_v41 = vadd.f32 %v1125_v38, %v2575_v55  ;;  %v1407_v42 = vadd.f32 %v1406_v40, %v2577_v56  ;;  %v1127_v43 = vpop.f32.mrb[73].mxu1  ;;  %v1408_v44 = vpop.f32.mrb[77].mxu0 }
 0x21d   : > { %v1128_v45 = vadd.f32 %v1127_v43, %v2579_v2  ;;  %v1409_v46 = vadd.f32 %v1408_v44, %v2581_v58  ;;  %v1129_v47 = vpop.f32.mrb[74].mxu1  ;;  %v1410_v49 = vpop.f32.mrb[78].mxu0 }
 0x21e   : > { %1641 = vst [vmem:[%s2586_s27 + $0x180] sm:$0xff] %v1126_v41  ;;  %1643 = vst [vmem:[%s2586_s27 + $0x190] sm:$0xff] %v1407_v42  ;;  %v1130_v50 = vadd.f32 %v1129_v47, %v2575_v55  ;;  %v1411_v52 = vadd.f32 %v1410_v49, %v2577_v56  ;;  %v1131_v53 = vpop.f32.mrb[75].mxu1  ;;  %v1412_v54 = vpop.f32.mrb[79].mxu0 }
 0x21f   : > { %1642 = vst [vmem:[%s2586_s27 + $0x188] sm:$0xff] %v1128_v45  ;;  %1644 = vst [vmem:[%s2586_s27 + $0x198] sm:$0xff] %v1409_v46  ;;  %v1132_v21 = vadd.f32 %v1131_v53, %v2579_v2  ;;  %v1413_v39 = vadd.f32 %v1412_v54, %v2581_v58 }
 0x220   : > { %1645 = vst [vmem:[%s2586_s27 + $0x1a0] sm:$0xff] %v1130_v50  ;;  %1647 = vst [vmem:[%s2586_s27 + $0x1b0] sm:$0xff] %v1411_v52 }
 0x221   : > { %1646 = vst [vmem:[%s2586_s27 + $0x1a8] sm:$0xff] %v1132_v21  ;;  %1648 = vst [vmem:[%s2586_s27 + $0x1b8] sm:$0xff] %v1413_v39 }
 0x223   : > { %v1135_v57 = vpop.f32.mrb[76].mxu1  ;;  %v1416_v13 = vpop.f32.mrb[80].mxu0 }
 0x224   : > { %v1136_v32 = vadd.f32 %v1135_v57, %v2575_v55  ;;  %v1417_v4 = vadd.f32 %v1416_v13, %v2577_v56  ;;  %v1137_v51 = vpop.f32.mrb[77].mxu1  ;;  %v1418_v0 = vpop.f32.mrb[81].mxu0 }
 0x225   : > { %v1138_v28 = vadd.f32 %v1137_v51, %v2579_v2  ;;  %v1419_v48 = vadd.f32 %v1418_v0, %v2581_v58  ;;  %v1139_v59 = vpop.f32.mrb[78].mxu1  ;;  %v1420_v60 = vpop.f32.mrb[82].mxu0 }
 0x226   : > { %1649 = vst [vmem:[%s2586_s27 + $0x1c0] sm:$0xff] %v1136_v32  ;;  %1651 = vst [vmem:[%s2586_s27 + $0x1d0] sm:$0xff] %v1417_v4  ;;  %v1140_v61 = vadd.f32 %v1139_v59, %v2575_v55  ;;  %v1421_v62 = vadd.f32 %v1420_v60, %v2577_v56  ;;  %v1141_v63 = vpop.f32.mrb[79].mxu1  ;;  %v1422_v1 = vpop.f32.mrb[83].mxu0 }
 0x227   : > { %1650 = vst [vmem:[%s2586_s27 + $0x1c8] sm:$0xff] %v1138_v28  ;;  %1652 = vst [vmem:[%s2586_s27 + $0x1d8] sm:$0xff] %v1419_v48  ;;  %v1142_v3 = vadd.f32 %v1141_v63, %v2579_v2  ;;  %v1423_v5 = vadd.f32 %v1422_v1, %v2581_v58 }
 0x228   : > { %1653 = vst [vmem:[%s2586_s27 + $0x1e0] sm:$0xff] %v1140_v61  ;;  %1655 = vst [vmem:[%s2586_s27 + $0x1f0] sm:$0xff] %v1421_v62 }
 0x229   : > { %1654 = vst [vmem:[%s2586_s27 + $0x1e8] sm:$0xff] %v1142_v3  ;;  %1656 = vst [vmem:[%s2586_s27 + $0x1f8] sm:$0xff] %v1423_v5 }
 0x22b   : > { %v1145_v6 = vpop.f32.mrb[80].mxu1  ;;  %v1426_v7 = vpop.f32.mrb[84].mxu0 }
 0x22c   : > { %v1146_v8 = vadd.f32 %v1145_v6, %v2575_v55  ;;  %v1427_v9 = vadd.f32 %v1426_v7, %v2577_v56  ;;  %v1147_v10 = vpop.f32.mrb[81].mxu1  ;;  %v1428_v11 = vpop.f32.mrb[85].mxu0 }
 0x22d   : > { %v1148_v12 = vadd.f32 %v1147_v10, %v2579_v2  ;;  %v1429_v14 = vadd.f32 %v1428_v11, %v2581_v58  ;;  %v1149_v15 = vpop.f32.mrb[82].mxu1  ;;  %v1430_v16 = vpop.f32.mrb[86].mxu0 }
 0x22e   : > { %1657 = vst [vmem:[%s2586_s27 + $0x200] sm:$0xff] %v1146_v8  ;;  %1659 = vst [vmem:[%s2586_s27 + $0x210] sm:$0xff] %v1427_v9  ;;  %v1150_v17 = vadd.f32 %v1149_v15, %v2575_v55  ;;  %v1431_v18 = vadd.f32 %v1430_v16, %v2577_v56  ;;  %v1151_v19 = vpop.f32.mrb[83].mxu1  ;;  %v1432_v20 = vpop.f32.mrb[87].mxu0 }
 0x22f   : > { %1658 = vst [vmem:[%s2586_s27 + $0x208] sm:$0xff] %v1148_v12  ;;  %1660 = vst [vmem:[%s2586_s27 + $0x218] sm:$0xff] %v1429_v14  ;;  %v1152_v22 = vadd.f32 %v1151_v19, %v2579_v2  ;;  %v1433_v23 = vadd.f32 %v1432_v20, %v2581_v58 }
 0x230   : > { %1661 = vst [vmem:[%s2586_s27 + $0x220] sm:$0xff] %v1150_v17  ;;  %1663 = vst [vmem:[%s2586_s27 + $0x230] sm:$0xff] %v1431_v18 }
 0x231   : > { %1662 = vst [vmem:[%s2586_s27 + $0x228] sm:$0xff] %v1152_v22  ;;  %1664 = vst [vmem:[%s2586_s27 + $0x238] sm:$0xff] %v1433_v23 }
 0x233   : > { %v1155_v24 = vpop.f32.mrb[84].mxu1  ;;  %v1436_v25 = vpop.f32.mrb[88].mxu0 }
 0x234   : > { %v1156_v26 = vadd.f32 %v1155_v24, %v2575_v55  ;;  %v1437_v27 = vadd.f32 %v1436_v25, %v2577_v56  ;;  %v1157_v29 = vpop.f32.mrb[85].mxu1  ;;  %v1438_v30 = vpop.f32.mrb[89].mxu0 }
 0x235   : > { %v1158_v31 = vadd.f32 %v1157_v29, %v2579_v2  ;;  %v1439_v33 = vadd.f32 %v1438_v30, %v2581_v58  ;;  %v1159_v34 = vpop.f32.mrb[86].mxu1  ;;  %v1440_v35 = vpop.f32.mrb[90].mxu0 }
 0x236   : > { %1665 = vst [vmem:[%s2586_s27 + $0x240] sm:$0xff] %v1156_v26  ;;  %1667 = vst [vmem:[%s2586_s27 + $0x250] sm:$0xff] %v1437_v27  ;;  %v1160_v36 = vadd.f32 %v1159_v34, %v2575_v55  ;;  %v1441_v37 = vadd.f32 %v1440_v35, %v2577_v56  ;;  %v1161_v38 = vpop.f32.mrb[87].mxu1  ;;  %v1442_v40 = vpop.f32.mrb[91].mxu0 }
 0x237   : > { %1666 = vst [vmem:[%s2586_s27 + $0x248] sm:$0xff] %v1158_v31  ;;  %1668 = vst [vmem:[%s2586_s27 + $0x258] sm:$0xff] %v1439_v33  ;;  %v1162_v41 = vadd.f32 %v1161_v38, %v2579_v2  ;;  %v1443_v42 = vadd.f32 %v1442_v40, %v2581_v58 }
 0x238   : > { %1669 = vst [vmem:[%s2586_s27 + $0x260] sm:$0xff] %v1160_v36  ;;  %1671 = vst [vmem:[%s2586_s27 + $0x270] sm:$0xff] %v1441_v37 }
 0x239   : > { %1670 = vst [vmem:[%s2586_s27 + $0x268] sm:$0xff] %v1162_v41  ;;  %1672 = vst [vmem:[%s2586_s27 + $0x278] sm:$0xff] %v1443_v42 }
 0x23b   : > { %v1165_v43 = vpop.f32.mrb[88].mxu1  ;;  %v1446_v44 = vpop.f32.mrb[92].mxu0 }
 0x23c   : > { %v1166_v45 = vadd.f32 %v1165_v43, %v2575_v55  ;;  %v1447_v46 = vadd.f32 %v1446_v44, %v2577_v56  ;;  %v1167_v47 = vpop.f32.mrb[89].mxu1  ;;  %v1448_v49 = vpop.f32.mrb[93].mxu0 }
 0x23d   : > { %v1168_v50 = vadd.f32 %v1167_v47, %v2579_v2  ;;  %v1449_v52 = vadd.f32 %v1448_v49, %v2581_v58  ;;  %v1169_v53 = vpop.f32.mrb[90].mxu1  ;;  %v1450_v54 = vpop.f32.mrb[94].mxu0 }
 0x23e   : > { %1673 = vst [vmem:[%s2586_s27 + $0x280] sm:$0xff] %v1166_v45  ;;  %1675 = vst [vmem:[%s2586_s27 + $0x290] sm:$0xff] %v1447_v46  ;;  %v1170_v21 = vadd.f32 %v1169_v53, %v2575_v55  ;;  %v1451_v39 = vadd.f32 %v1450_v54, %v2577_v56  ;;  %v1171_v57 = vpop.f32.mrb[91].mxu1  ;;  %v1452_v13 = vpop.f32.mrb[95].mxu0 }
 0x23f   : > { %1674 = vst [vmem:[%s2586_s27 + $0x288] sm:$0xff] %v1168_v50  ;;  %1676 = vst [vmem:[%s2586_s27 + $0x298] sm:$0xff] %v1449_v52  ;;  %v1172_v32 = vadd.f32 %v1171_v57, %v2579_v2  ;;  %v1453_v4 = vadd.f32 %v1452_v13, %v2581_v58 }
 0x240   : > { %1677 = vst [vmem:[%s2586_s27 + $0x2a0] sm:$0xff] %v1170_v21  ;;  %1679 = vst [vmem:[%s2586_s27 + $0x2b0] sm:$0xff] %v1451_v39 }
 0x241   : > { %1678 = vst [vmem:[%s2586_s27 + $0x2a8] sm:$0xff] %v1172_v32  ;;  %1680 = vst [vmem:[%s2586_s27 + $0x2b8] sm:$0xff] %v1453_v4 }
 0x243   : > { %v1175_v51 = vpop.f32.mrb[92].mxu1  ;;  %v1456_v0 = vpop.f32.mrb[96].mxu0 }
 0x244   : > { %v1176_v28 = vadd.f32 %v1175_v51, %v2575_v55  ;;  %v1457_v48 = vadd.f32 %v1456_v0, %v2577_v56  ;;  %v1177_v59 = vpop.f32.mrb[93].mxu1  ;;  %v1458_v60 = vpop.f32.mrb[97].mxu0 }
 0x245   : > { %v1178_v61 = vadd.f32 %v1177_v59, %v2579_v2  ;;  %v1459_v62 = vadd.f32 %v1458_v60, %v2581_v58  ;;  %v1179_v63 = vpop.f32.mrb[94].mxu1  ;;  %v1460_v1 = vpop.f32.mrb[98].mxu0 }
 0x246   : > { %1681 = vst [vmem:[%s2586_s27 + $0x2c0] sm:$0xff] %v1176_v28  ;;  %1683 = vst [vmem:[%s2586_s27 + $0x2d0] sm:$0xff] %v1457_v48  ;;  %v1180_v3 = vadd.f32 %v1179_v63, %v2575_v55  ;;  %v1461_v5 = vadd.f32 %v1460_v1, %v2577_v56  ;;  %v1181_v6 = vpop.f32.mrb[95].mxu1  ;;  %v1462_v7 = vpop.f32.mrb[99].mxu0 }
 0x247   : > { %1682 = vst [vmem:[%s2586_s27 + $0x2c8] sm:$0xff] %v1178_v61  ;;  %1684 = vst [vmem:[%s2586_s27 + $0x2d8] sm:$0xff] %v1459_v62  ;;  %v1182_v8 = vadd.f32 %v1181_v6, %v2579_v2  ;;  %v1463_v9 = vadd.f32 %v1462_v7, %v2581_v58 }
 0x248   : > { %1685 = vst [vmem:[%s2586_s27 + $0x2e0] sm:$0xff] %v1180_v3  ;;  %1687 = vst [vmem:[%s2586_s27 + $0x2f0] sm:$0xff] %v1461_v5 }
 0x249   : > { %1686 = vst [vmem:[%s2586_s27 + $0x2e8] sm:$0xff] %v1182_v8  ;;  %1688 = vst [vmem:[%s2586_s27 + $0x2f8] sm:$0xff] %v1463_v9 }
 0x24b   : > { %v1185_v10 = vpop.f32.mrb[96].mxu1  ;;  %v1466_v11 = vpop.f32.mrb[100].mxu0 }
 0x24c   : > { %v1186_v12 = vadd.f32 %v1185_v10, %v2575_v55  ;;  %v1467_v14 = vadd.f32 %v1466_v11, %v2577_v56  ;;  %v1187_v15 = vpop.f32.mrb[97].mxu1  ;;  %v1468_v16 = vpop.f32.mrb[101].mxu0 }
 0x24d   : > { %v1188_v17 = vadd.f32 %v1187_v15, %v2579_v2  ;;  %v1469_v18 = vadd.f32 %v1468_v16, %v2581_v58  ;;  %v1189_v19 = vpop.f32.mrb[98].mxu1  ;;  %v1470_v20 = vpop.f32.mrb[102].mxu0 }
 0x24e   : > { %1689 = vst [vmem:[%s2586_s27 + $0x300] sm:$0xff] %v1186_v12  ;;  %1691 = vst [vmem:[%s2586_s27 + $0x310] sm:$0xff] %v1467_v14  ;;  %v1190_v22 = vadd.f32 %v1189_v19, %v2575_v55  ;;  %v1471_v23 = vadd.f32 %v1470_v20, %v2577_v56  ;;  %v1191_v24 = vpop.f32.mrb[99].mxu1  ;;  %v1472_v25 = vpop.f32.mrb[103].mxu0 }
 0x24f   : > { %1690 = vst [vmem:[%s2586_s27 + $0x308] sm:$0xff] %v1188_v17  ;;  %1692 = vst [vmem:[%s2586_s27 + $0x318] sm:$0xff] %v1469_v18  ;;  %v1192_v26 = vadd.f32 %v1191_v24, %v2579_v2  ;;  %v1473_v27 = vadd.f32 %v1472_v25, %v2581_v58 }
 0x250   : > { %1693 = vst [vmem:[%s2586_s27 + $0x320] sm:$0xff] %v1190_v22  ;;  %1695 = vst [vmem:[%s2586_s27 + $0x330] sm:$0xff] %v1471_v23 }
 0x251   : > { %1694 = vst [vmem:[%s2586_s27 + $0x328] sm:$0xff] %v1192_v26  ;;  %1696 = vst [vmem:[%s2586_s27 + $0x338] sm:$0xff] %v1473_v27 }
 0x253   : > { %v1195_v29 = vpop.f32.mrb[100].mxu1  ;;  %v1476_v30 = vpop.f32.mrb[104].mxu0 }
 0x254   : > { %v1196_v31 = vadd.f32 %v1195_v29, %v2575_v55  ;;  %v1477_v33 = vadd.f32 %v1476_v30, %v2577_v56  ;;  %v1197_v34 = vpop.f32.mrb[101].mxu1  ;;  %v1478_v35 = vpop.f32.mrb[105].mxu0 }
 0x255   : > { %v1198_v36 = vadd.f32 %v1197_v34, %v2579_v2  ;;  %v1479_v37 = vadd.f32 %v1478_v35, %v2581_v58  ;;  %v1199_v38 = vpop.f32.mrb[102].mxu1  ;;  %v1480_v40 = vpop.f32.mrb[106].mxu0 }
 0x256   : > { %1697 = vst [vmem:[%s2586_s27 + $0x340] sm:$0xff] %v1196_v31  ;;  %1699 = vst [vmem:[%s2586_s27 + $0x350] sm:$0xff] %v1477_v33  ;;  %v1200_v41 = vadd.f32 %v1199_v38, %v2575_v55  ;;  %v1481_v42 = vadd.f32 %v1480_v40, %v2577_v56  ;;  %v1201_v43 = vpop.f32.mrb[103].mxu1  ;;  %v1482_v44 = vpop.f32.mrb[107].mxu0 }
 0x257   : > { %1698 = vst [vmem:[%s2586_s27 + $0x348] sm:$0xff] %v1198_v36  ;;  %1700 = vst [vmem:[%s2586_s27 + $0x358] sm:$0xff] %v1479_v37  ;;  %v1202_v45 = vadd.f32 %v1201_v43, %v2579_v2  ;;  %v1483_v46 = vadd.f32 %v1482_v44, %v2581_v58 }
 0x258   : > { %1701 = vst [vmem:[%s2586_s27 + $0x360] sm:$0xff] %v1200_v41  ;;  %1703 = vst [vmem:[%s2586_s27 + $0x370] sm:$0xff] %v1481_v42 }
 0x259   : > { %1702 = vst [vmem:[%s2586_s27 + $0x368] sm:$0xff] %v1202_v45  ;;  %1704 = vst [vmem:[%s2586_s27 + $0x378] sm:$0xff] %v1483_v46 }
 0x25b   : > { %v1205_v47 = vpop.f32.mrb[104].mxu1  ;;  %v1486_v49 = vpop.f32.mrb[108].mxu0 }
 0x25c   : > { %v1206_v50 = vadd.f32 %v1205_v47, %v2575_v55  ;;  %v1487_v52 = vadd.f32 %v1486_v49, %v2577_v56  ;;  %v1207_v53 = vpop.f32.mrb[105].mxu1  ;;  %v1488_v54 = vpop.f32.mrb[109].mxu0 }
 0x25d   : > { %v1208_v21 = vadd.f32 %v1207_v53, %v2579_v2  ;;  %v1489_v39 = vadd.f32 %v1488_v54, %v2581_v58  ;;  %v1209_v57 = vpop.f32.mrb[106].mxu1  ;;  %v1490_v13 = vpop.f32.mrb[110].mxu0 }
 0x25e   : > { %1705 = vst [vmem:[%s2586_s27 + $0x380] sm:$0xff] %v1206_v50  ;;  %1707 = vst [vmem:[%s2586_s27 + $0x390] sm:$0xff] %v1487_v52  ;;  %v1210_v32 = vadd.f32 %v1209_v57, %v2575_v55  ;;  %v1491_v4 = vadd.f32 %v1490_v13, %v2577_v56  ;;  %v1211_v51 = vpop.f32.mrb[107].mxu1  ;;  %v1492_v0 = vpop.f32.mrb[111].mxu0 }
 0x25f   : > { %1706 = vst [vmem:[%s2586_s27 + $0x388] sm:$0xff] %v1208_v21  ;;  %1708 = vst [vmem:[%s2586_s27 + $0x398] sm:$0xff] %v1489_v39  ;;  %v1212_v28 = vadd.f32 %v1211_v51, %v2579_v2  ;;  %v1493_v48 = vadd.f32 %v1492_v0, %v2581_v58 }
 0x260   : > { %1709 = vst [vmem:[%s2586_s27 + $0x3a0] sm:$0xff] %v1210_v32  ;;  %1711 = vst [vmem:[%s2586_s27 + $0x3b0] sm:$0xff] %v1491_v4 }
 0x261   : > { %1710 = vst [vmem:[%s2586_s27 + $0x3a8] sm:$0xff] %v1212_v28  ;;  %1712 = vst [vmem:[%s2586_s27 + $0x3b8] sm:$0xff] %v1493_v48 }
 0x263   : > { %v1215_v59 = vpop.f32.mrb[108].mxu1  ;;  %v1496_v60 = vpop.f32.mrb[112].mxu0 }
 0x264   : > { %v1216_v61 = vadd.f32 %v1215_v59, %v2575_v55  ;;  %v1497_v62 = vadd.f32 %v1496_v60, %v2577_v56  ;;  %v1217_v63 = vpop.f32.mrb[109].mxu1  ;;  %v1498_v1 = vpop.f32.mrb[113].mxu0 }
 0x265   : > { %v1218_v3 = vadd.f32 %v1217_v63, %v2579_v2  ;;  %v1499_v5 = vadd.f32 %v1498_v1, %v2581_v58  ;;  %v1219_v6 = vpop.f32.mrb[110].mxu1  ;;  %v1500_v7 = vpop.f32.mrb[114].mxu0 }
 0x266   : > { %1713 = vst [vmem:[%s2586_s27 + $0x3c0] sm:$0xff] %v1216_v61  ;;  %1715 = vst [vmem:[%s2586_s27 + $0x3d0] sm:$0xff] %v1497_v62  ;;  %v1220_v8 = vadd.f32 %v1219_v6, %v2575_v55  ;;  %v1501_v9 = vadd.f32 %v1500_v7, %v2577_v56  ;;  %v1221_v10 = vpop.f32.mrb[111].mxu1  ;;  %v1502_v11 = vpop.f32.mrb[115].mxu0 }
 0x267   : > { %1714 = vst [vmem:[%s2586_s27 + $0x3c8] sm:$0xff] %v1218_v3  ;;  %1716 = vst [vmem:[%s2586_s27 + $0x3d8] sm:$0xff] %v1499_v5  ;;  %v1222_v12 = vadd.f32 %v1221_v10, %v2579_v2  ;;  %v1503_v14 = vadd.f32 %v1502_v11, %v2581_v58 }
 0x268   : > { %1717 = vst [vmem:[%s2586_s27 + $0x3e0] sm:$0xff] %v1220_v8  ;;  %1719 = vst [vmem:[%s2586_s27 + $0x3f0] sm:$0xff] %v1501_v9 }
 0x269   : > { %1718 = vst [vmem:[%s2586_s27 + $0x3e8] sm:$0xff] %v1222_v12  ;;  %1720 = vst [vmem:[%s2586_s27 + $0x3f8] sm:$0xff] %v1503_v14 }
 0x26b   : > { %v1225_v15 = vpop.f32.mrb[112].mxu1  ;;  %v1506_v16 = vpop.f32.mrb[116].mxu0 }
 0x26c   : > { %v1226_v17 = vadd.f32 %v1225_v15, %v2575_v55  ;;  %v1507_v18 = vadd.f32 %v1506_v16, %v2577_v56  ;;  %v1227_v19 = vpop.f32.mrb[113].mxu1  ;;  %v1508_v20 = vpop.f32.mrb[117].mxu0 }
 0x26d   : > { %v1228_v22 = vadd.f32 %v1227_v19, %v2579_v2  ;;  %v1509_v23 = vadd.f32 %v1508_v20, %v2581_v58  ;;  %v1229_v24 = vpop.f32.mrb[114].mxu1  ;;  %v1510_v25 = vpop.f32.mrb[118].mxu0 }
 0x26e   : > { %1721 = vst [vmem:[%s2586_s27 + $0x400] sm:$0xff] %v1226_v17  ;;  %1723 = vst [vmem:[%s2586_s27 + $0x410] sm:$0xff] %v1507_v18  ;;  %v1230_v26 = vadd.f32 %v1229_v24, %v2575_v55  ;;  %v1511_v27 = vadd.f32 %v1510_v25, %v2577_v56  ;;  %v1231_v29 = vpop.f32.mrb[115].mxu1  ;;  %v1512_v30 = vpop.f32.mrb[119].mxu0 }
 0x26f   : > { %1722 = vst [vmem:[%s2586_s27 + $0x408] sm:$0xff] %v1228_v22  ;;  %1724 = vst [vmem:[%s2586_s27 + $0x418] sm:$0xff] %v1509_v23  ;;  %v1232_v31 = vadd.f32 %v1231_v29, %v2579_v2  ;;  %v1513_v33 = vadd.f32 %v1512_v30, %v2581_v58 }
 0x270   : > { %1725 = vst [vmem:[%s2586_s27 + $0x420] sm:$0xff] %v1230_v26  ;;  %1727 = vst [vmem:[%s2586_s27 + $0x430] sm:$0xff] %v1511_v27 }
 0x271   : > { %1726 = vst [vmem:[%s2586_s27 + $0x428] sm:$0xff] %v1232_v31  ;;  %1728 = vst [vmem:[%s2586_s27 + $0x438] sm:$0xff] %v1513_v33 }
 0x273   : > { %v1235_v34 = vpop.f32.mrb[116].mxu1  ;;  %v1516_v35 = vpop.f32.mrb[120].mxu0 }
 0x274   : > { %v1236_v36 = vadd.f32 %v1235_v34, %v2575_v55  ;;  %v1517_v37 = vadd.f32 %v1516_v35, %v2577_v56  ;;  %v1237_v38 = vpop.f32.mrb[117].mxu1  ;;  %v1518_v40 = vpop.f32.mrb[121].mxu0 }
 0x275   : > { %v1238_v41 = vadd.f32 %v1237_v38, %v2579_v2  ;;  %v1519_v42 = vadd.f32 %v1518_v40, %v2581_v58  ;;  %v1239_v43 = vpop.f32.mrb[118].mxu1  ;;  %v1520_v44 = vpop.f32.mrb[122].mxu0 }
 0x276   : > { %1729 = vst [vmem:[%s2586_s27 + $0x440] sm:$0xff] %v1236_v36  ;;  %1731 = vst [vmem:[%s2586_s27 + $0x450] sm:$0xff] %v1517_v37  ;;  %v1240_v45 = vadd.f32 %v1239_v43, %v2575_v55  ;;  %v1521_v46 = vadd.f32 %v1520_v44, %v2577_v56  ;;  %v1241_v47 = vpop.f32.mrb[119].mxu1  ;;  %v1522_v49 = vpop.f32.mrb[123].mxu0 }
 0x277   : > { %1730 = vst [vmem:[%s2586_s27 + $0x448] sm:$0xff] %v1238_v41  ;;  %1732 = vst [vmem:[%s2586_s27 + $0x458] sm:$0xff] %v1519_v42  ;;  %v1242_v50 = vadd.f32 %v1241_v47, %v2579_v2  ;;  %v1523_v52 = vadd.f32 %v1522_v49, %v2581_v58 }
 0x278   : > { %1733 = vst [vmem:[%s2586_s27 + $0x460] sm:$0xff] %v1240_v45  ;;  %1735 = vst [vmem:[%s2586_s27 + $0x470] sm:$0xff] %v1521_v46 }
 0x279   : > { %1734 = vst [vmem:[%s2586_s27 + $0x468] sm:$0xff] %v1242_v50  ;;  %1736 = vst [vmem:[%s2586_s27 + $0x478] sm:$0xff] %v1523_v52 }
 0x27b   : > { %v1245_v53 = vpop.f32.mrb[120].mxu1  ;;  %v1526_v54 = vpop.f32.mrb[124].mxu0 }
 0x27c   : > { %v1246_v21 = vadd.f32 %v1245_v53, %v2575_v55  ;;  %v1527_v39 = vadd.f32 %v1526_v54, %v2577_v56  ;;  %v1247_v57 = vpop.f32.mrb[121].mxu1  ;;  %v1528_v13 = vpop.f32.mrb[125].mxu0 }
 0x27d   : > { %v1248_v32 = vadd.f32 %v1247_v57, %v2579_v2  ;;  %v1529_v4 = vadd.f32 %v1528_v13, %v2581_v58  ;;  %v1249_v51 = vpop.f32.mrb[122].mxu1  ;;  %v1530_v0 = vpop.f32.mrb[126].mxu0 }
 0x27e   : > { %1737 = vst [vmem:[%s2586_s27 + $0x480] sm:$0xff] %v1246_v21  ;;  %1739 = vst [vmem:[%s2586_s27 + $0x490] sm:$0xff] %v1527_v39  ;;  %v1250_v28 = vadd.f32 %v1249_v51, %v2575_v55  ;;  %v1531_v48 = vadd.f32 %v1530_v0, %v2577_v56  ;;  %v1251_v59 = vpop.f32.mrb[123].mxu1  ;;  %v1532_v60 = vpop.f32.mrb[127].mxu0 }
 0x27f   : > { %1738 = vst [vmem:[%s2586_s27 + $0x488] sm:$0xff] %v1248_v32  ;;  %1740 = vst [vmem:[%s2586_s27 + $0x498] sm:$0xff] %v1529_v4  ;;  %v1252_v61 = vadd.f32 %v1251_v59, %v2579_v2  ;;  %v1533_v62 = vadd.f32 %v1532_v60, %v2581_v58 }
 0x280   : > { %1741 = vst [vmem:[%s2586_s27 + $0x4a0] sm:$0xff] %v1250_v28  ;;  %1743 = vst [vmem:[%s2586_s27 + $0x4b0] sm:$0xff] %v1531_v48 }
 0x281   : > { %1742 = vst [vmem:[%s2586_s27 + $0x4a8] sm:$0xff] %v1252_v61  ;;  %1744 = vst [vmem:[%s2586_s27 + $0x4b8] sm:$0xff] %v1533_v62 }
 0x283   : > { %v1255_v63 = vpop.f32.mrb[124].mxu1  ;;  %v1536_v1 = vpop.f32.mrb[128].mxu0 }
 0x284   : > { %v1256_v3 = vadd.f32 %v1255_v63, %v2575_v55  ;;  %v1537_v5 = vadd.f32 %v1536_v1, %v2577_v56  ;;  %v1257_v6 = vpop.f32.mrb[125].mxu1  ;;  %v1538_v7 = vpop.f32.mrb[129].mxu0 }
 0x285   : > { %v1258_v8 = vadd.f32 %v1257_v6, %v2579_v2  ;;  %v1539_v9 = vadd.f32 %v1538_v7, %v2581_v58  ;;  %v1259_v10 = vpop.f32.mrb[126].mxu1  ;;  %v1540_v11 = vpop.f32.mrb[130].mxu0 }
 0x286   : > { %1745 = vst [vmem:[%s2586_s27 + $0x4c0] sm:$0xff] %v1256_v3  ;;  %1747 = vst [vmem:[%s2586_s27 + $0x4d0] sm:$0xff] %v1537_v5  ;;  %v1260_v12 = vadd.f32 %v1259_v10, %v2575_v55  ;;  %v1541_v14 = vadd.f32 %v1540_v11, %v2577_v56  ;;  %v1261_v15 = vpop.f32.mrb[127].mxu1  ;;  %v1542_v16 = vpop.f32.mrb[131].mxu0 }
 0x287   : > { %1746 = vst [vmem:[%s2586_s27 + $0x4c8] sm:$0xff] %v1258_v8  ;;  %1748 = vst [vmem:[%s2586_s27 + $0x4d8] sm:$0xff] %v1539_v9  ;;  %v1262_v17 = vadd.f32 %v1261_v15, %v2579_v2  ;;  %v1543_v18 = vadd.f32 %v1542_v16, %v2581_v58 }
 0x288   : > { %1749 = vst [vmem:[%s2586_s27 + $0x4e0] sm:$0xff] %v1260_v12  ;;  %1751 = vst [vmem:[%s2586_s27 + $0x4f0] sm:$0xff] %v1541_v14 }
 0x289   : > { %1750 = vst [vmem:[%s2586_s27 + $0x4e8] sm:$0xff] %v1262_v17  ;;  %1752 = vst [vmem:[%s2586_s27 + $0x4f8] sm:$0xff] %v1543_v18 }
 0x28b   : > { %v1265_v19 = vpop.f32.mrb[128].mxu1  ;;  %v1546_v20 = vpop.f32.mrb[132].mxu0 }
 0x28c   : > { %v1266_v22 = vadd.f32 %v1265_v19, %v2575_v55  ;;  %v1547_v23 = vadd.f32 %v1546_v20, %v2577_v56  ;;  %v1267_v24 = vpop.f32.mrb[129].mxu1  ;;  %v1548_v25 = vpop.f32.mrb[133].mxu0 }
 0x28d   : > { %v1268_v26 = vadd.f32 %v1267_v24, %v2579_v2  ;;  %v1549_v27 = vadd.f32 %v1548_v25, %v2581_v58  ;;  %v1269_v29 = vpop.f32.mrb[130].mxu1  ;;  %v1550_v30 = vpop.f32.mrb[134].mxu0 }
 0x28e   : > { %1753 = vst [vmem:[%s2586_s27 + $0x500] sm:$0xff] %v1266_v22  ;;  %1755 = vst [vmem:[%s2586_s27 + $0x510] sm:$0xff] %v1547_v23  ;;  %v1270_v31 = vadd.f32 %v1269_v29, %v2575_v55  ;;  %v1551_v33 = vadd.f32 %v1550_v30, %v2577_v56  ;;  %v1271_v34 = vpop.f32.mrb[131].mxu1  ;;  %v1552_v35 = vpop.f32.mrb[135].mxu0 }
 0x28f   : > { %1754 = vst [vmem:[%s2586_s27 + $0x508] sm:$0xff] %v1268_v26  ;;  %1756 = vst [vmem:[%s2586_s27 + $0x518] sm:$0xff] %v1549_v27  ;;  %v1272_v36 = vadd.f32 %v1271_v34, %v2579_v2  ;;  %v1553_v37 = vadd.f32 %v1552_v35, %v2581_v58 }
 0x290   : > { %1757 = vst [vmem:[%s2586_s27 + $0x520] sm:$0xff] %v1270_v31  ;;  %1759 = vst [vmem:[%s2586_s27 + $0x530] sm:$0xff] %v1551_v33 }
 0x291   : > { %1758 = vst [vmem:[%s2586_s27 + $0x528] sm:$0xff] %v1272_v36  ;;  %1760 = vst [vmem:[%s2586_s27 + $0x538] sm:$0xff] %v1553_v37 }
 0x293   : > { %v1275_v38 = vpop.f32.mrb[132].mxu1  ;;  %v1556_v40 = vpop.f32.mrb[136].mxu0 }
 0x294   : > { %v1276_v41 = vadd.f32 %v1275_v38, %v2575_v55  ;;  %v1557_v42 = vadd.f32 %v1556_v40, %v2577_v56  ;;  %v1277_v43 = vpop.f32.mrb[133].mxu1  ;;  %v1558_v44 = vpop.f32.mrb[137].mxu0 }
 0x295   : > { %v1278_v45 = vadd.f32 %v1277_v43, %v2579_v2  ;;  %v1559_v46 = vadd.f32 %v1558_v44, %v2581_v58  ;;  %v1279_v47 = vpop.f32.mrb[134].mxu1  ;;  %v1560_v49 = vpop.f32.mrb[138].mxu0 }
 0x296   : > { %1761 = vst [vmem:[%s2586_s27 + $0x540] sm:$0xff] %v1276_v41  ;;  %1763 = vst [vmem:[%s2586_s27 + $0x550] sm:$0xff] %v1557_v42  ;;  %v1280_v50 = vadd.f32 %v1279_v47, %v2575_v55  ;;  %v1561_v52 = vadd.f32 %v1560_v49, %v2577_v56  ;;  %v1281_v53 = vpop.f32.mrb[135].mxu1  ;;  %v1562_v54 = vpop.f32.mrb[139].mxu0 }
 0x297   : > { %1762 = vst [vmem:[%s2586_s27 + $0x548] sm:$0xff] %v1278_v45  ;;  %1764 = vst [vmem:[%s2586_s27 + $0x558] sm:$0xff] %v1559_v46  ;;  %v1282_v21 = vadd.f32 %v1281_v53, %v2579_v2  ;;  %v1563_v39 = vadd.f32 %v1562_v54, %v2581_v58 }
 0x298   : > { %1765 = vst [vmem:[%s2586_s27 + $0x560] sm:$0xff] %v1280_v50  ;;  %1767 = vst [vmem:[%s2586_s27 + $0x570] sm:$0xff] %v1561_v52 }
 0x299   : > { %1766 = vst [vmem:[%s2586_s27 + $0x568] sm:$0xff] %v1282_v21  ;;  %1768 = vst [vmem:[%s2586_s27 + $0x578] sm:$0xff] %v1563_v39 }
 0x29b   : > { %v1285_v57 = vpop.f32.mrb[136].mxu1  ;;  %v1566_v13 = vpop.f32.mrb[140].mxu0 }
 0x29c   : > { %v1286_v32 = vadd.f32 %v1285_v57, %v2575_v55  ;;  %v1567_v4 = vadd.f32 %v1566_v13, %v2577_v56  ;;  %v1287_v51 = vpop.f32.mrb[137].mxu1  ;;  %v1568_v0 = vpop.f32.mrb[141].mxu0 }
 0x29d   : > { %v1288_v28 = vadd.f32 %v1287_v51, %v2579_v2  ;;  %v1569_v48 = vadd.f32 %v1568_v0, %v2581_v58  ;;  %v1289_v59 = vpop.f32.mrb[138].mxu1  ;;  %v1570_v60 = vpop.f32.mrb[142].mxu0 }
 0x29e   : > { %1769 = vst [vmem:[%s2586_s27 + $0x580] sm:$0xff] %v1286_v32  ;;  %1771 = vst [vmem:[%s2586_s27 + $0x590] sm:$0xff] %v1567_v4  ;;  %v1290_v61 = vadd.f32 %v1289_v59, %v2575_v55  ;;  %v1571_v62 = vadd.f32 %v1570_v60, %v2577_v56  ;;  %v1291_v63 = vpop.f32.mrb[139].mxu1  ;;  %v1572_v1 = vpop.f32.mrb[143].mxu0 }
 0x29f   : > { %1770 = vst [vmem:[%s2586_s27 + $0x588] sm:$0xff] %v1288_v28  ;;  %1772 = vst [vmem:[%s2586_s27 + $0x598] sm:$0xff] %v1569_v48  ;;  %v1292_v3 = vadd.f32 %v1291_v63, %v2579_v2  ;;  %v1573_v5 = vadd.f32 %v1572_v1, %v2581_v58 }
 0x2a0   : > { %1773 = vst [vmem:[%s2586_s27 + $0x5a0] sm:$0xff] %v1290_v61  ;;  %1775 = vst [vmem:[%s2586_s27 + $0x5b0] sm:$0xff] %v1571_v62 }
 0x2a1   : > { %1774 = vst [vmem:[%s2586_s27 + $0x5a8] sm:$0xff] %v1292_v3  ;;  %1776 = vst [vmem:[%s2586_s27 + $0x5b8] sm:$0xff] %v1573_v5 }
 0x2a3   : > { %v1295_v6 = vpop.f32.mrb[140].mxu1  ;;  %v1576_v7 = vpop.f32.mrb[144].mxu0 }
 0x2a4   : > { %v1296_v8 = vadd.f32 %v1295_v6, %v2575_v55  ;;  %v1577_v9 = vadd.f32 %v1576_v7, %v2577_v56  ;;  %v1297_v10 = vpop.f32.mrb[141].mxu1  ;;  %v1578_v11 = vpop.f32.mrb[145].mxu0 }
 0x2a5   : > { %v1298_v12 = vadd.f32 %v1297_v10, %v2579_v2  ;;  %v1579_v14 = vadd.f32 %v1578_v11, %v2581_v58  ;;  %v1299_v15 = vpop.f32.mrb[142].mxu1  ;;  %v1580_v16 = vpop.f32.mrb[146].mxu0 }
 0x2a6   : > { %1777 = vst [vmem:[%s2586_s27 + $0x5c0] sm:$0xff] %v1296_v8  ;;  %1779 = vst [vmem:[%s2586_s27 + $0x5d0] sm:$0xff] %v1577_v9  ;;  %v1300_v17 = vadd.f32 %v1299_v15, %v2575_v55  ;;  %v1581_v18 = vadd.f32 %v1580_v16, %v2577_v56  ;;  %v1301_v19 = vpop.f32.mrb[143].mxu1  ;;  %v1582_v20 = vpop.f32.mrb[147].mxu0 }
 0x2a7   : > { %1778 = vst [vmem:[%s2586_s27 + $0x5c8] sm:$0xff] %v1298_v12  ;;  %1780 = vst [vmem:[%s2586_s27 + $0x5d8] sm:$0xff] %v1579_v14  ;;  %v1302_v22 = vadd.f32 %v1301_v19, %v2579_v2  ;;  %v1583_v23 = vadd.f32 %v1582_v20, %v2581_v58 }
 0x2a8   : > { %1781 = vst [vmem:[%s2586_s27 + $0x5e0] sm:$0xff] %v1300_v17  ;;  %1783 = vst [vmem:[%s2586_s27 + $0x5f0] sm:$0xff] %v1581_v18 }
 0x2a9   : > { %1782 = vst [vmem:[%s2586_s27 + $0x5e8] sm:$0xff] %v1302_v22  ;;  %1784 = vst [vmem:[%s2586_s27 + $0x5f8] sm:$0xff] %v1583_v23 }
 0x2ab   : > { %v1305_v24 = vpop.f32.mrb[144].mxu1  ;;  %v1586_v25 = vpop.f32.mrb[148].mxu0 }
 0x2ac   : > { %v1306_v26 = vadd.f32 %v1305_v24, %v2575_v55  ;;  %v1587_v27 = vadd.f32 %v1586_v25, %v2577_v56  ;;  %v1307_v29 = vpop.f32.mrb[145].mxu1  ;;  %v1588_v30 = vpop.f32.mrb[149].mxu0 }
 0x2ad   : > { %v1308_v31 = vadd.f32 %v1307_v29, %v2579_v2  ;;  %v1589_v33 = vadd.f32 %v1588_v30, %v2581_v58  ;;  %v1309_v34 = vpop.f32.mrb[146].mxu1  ;;  %v1590_v35 = vpop.f32.mrb[150].mxu0 }
 0x2ae   : > { %1785 = vst [vmem:[%s2586_s27 + $0x600] sm:$0xff] %v1306_v26  ;;  %1787 = vst [vmem:[%s2586_s27 + $0x610] sm:$0xff] %v1587_v27  ;;  %v1310_v36 = vpop.f32.mrb[147].mxu1  ;;  %v1591_v37 = vpop.f32.mrb[151].mxu0 }
 0x2af   : > { %1786 = vst [vmem:[%s2586_s27 + $0x608] sm:$0xff] %v1308_v31  ;;  %1788 = vst [vmem:[%s2586_s27 + $0x618] sm:$0xff] %v1589_v33 }
 0x2b0 PF: > { %s22_s26 = sadd.s32 1, %s2213_s26  }
 0x2b1   : > { %p19_p9 = scmp.ge.s32.totalorder %s22_s26, 4  }
 0x2b3   :  { %21 = sbr.rel (!%p19_p9) target bundleno = 16 (0x10), region = 74 }

</bundles_post_ra>
